<compile_context>
chip_gen: v7x
topology: tpu7x:2x2x1
jax: 0.10.0
libtpu: 0.0.40
codegen_flags: <defaults>
</compile_context>

<pallas_src>
import functools
import math

import jax
import jax.numpy as jnp
from jax.experimental import pallas as pl
from jax.experimental.pallas import tpu as pltpu

# ---------------- config ----------------
CHANNELS = 3
IMAGE = 16
PATCH = 8
WIDTH = 32                      # D
HEADS = 4                       # H
HEAD_DIM = WIDTH // HEADS       # Dh = 8
LAYERS = 2
MLP_DIM = 4 * WIDTH             # 128
RANK = 4
LORA_ALPHA = 8
LN_EPS = 1e-5
DTYPE = jnp.float32

GRID_SIDE = IMAGE // PATCH
N_PATCHES = GRID_SIDE * GRID_SIDE        # 4
SEQ = N_PATCHES + 1                      # 5 (class token + patches)
SEQ_PAD = 8                              # padded to a full sublane tile
PATCH_DIM = CHANNELS * PATCH * PATCH     # 192
LANE = 128

# ---- packed "vector blob" row layout (lane-padded to 128) ----
ROW_EMB = 0                    # 8 rows: [cls+pos0, pos1..pos4, 0, 0, 0]
ROW_LN_PRE_G = 8
ROW_LN_PRE_B = 9
ROW_LN_POST_G = 10
ROW_LN_POST_B = 11
ROW_LAYER0 = 12
R_LN1_G, R_LN1_B, R_LN2_G, R_LN2_B, R_OUT_B, R_PROJ_B, R_FC_B = range(7)
ROWS_PER_LAYER = 7
VEC_ROWS = ((ROW_LAYER0 + LAYERS * ROWS_PER_LAYER + 7) // 8) * 8   # 32


def _ln(x, g, b):
    """Row-wise LayerNorm on a VMEM value (f32 math)."""
    x = x.astype(jnp.float32)
    mu = jnp.mean(x, axis=-1, keepdims=True)
    var = jnp.mean(jnp.square(x - mu), axis=-1, keepdims=True)
    return (x - mu) * jax.lax.rsqrt(var + LN_EPS) * g + b


# ---------------- the single fused kernel (one batch element per grid step) ----------
def _clip_tower_kernel(patches_ref, conv_w_ref, vec_ref, w_qkvh_ref, b_qkvh_ref,
                       w_out_ref, w_fc_ref, w_proj_ref, o_ref, *, n_layers):
    f32 = jnp.float32
    D, H = WIDTH, HEADS

    vec = vec_ref[...]                                    # (VEC_ROWS, 128)

    def vrow(r, width=D):
        return vec[r:r + 1, 0:width]                      # (1, width)

    # --- conv1 (stride = patch, no bias) == patchify matmul ---
    pe = jnp.dot(patches_ref[0], conv_w_ref[...],
                 preferred_element_type=f32)              # (N_PATCHES, D)

    # --- [class ; patches] + positional embedding on the padded 8-row layout ---
    # x[0] = cls + pos[0]; x[1:SEQ] = pe + pos[1:SEQ]; x[SEQ:] = 0.
    # Tiny shift matmul keeps every row a full aligned tile (no offset-5 stores).
    ri = jax.lax.broadcasted_iota(jnp.int32, (SEQ_PAD, N_PATCHES), 0)
    ci = jax.lax.broadcasted_iota(jnp.int32, (SEQ_PAD, N_PATCHES), 1)
    shift = (ri == ci + 1).astype(f32)                    # (SEQ_PAD, N_PATCHES)
    x = jnp.dot(shift, pe, preferred_element_type=f32) \
        + vec[ROW_EMB:ROW_EMB + SEQ_PAD, 0:D]             # (SEQ_PAD, D)

    # --- ln_pre ---
    x = _ln(x, vrow(ROW_LN_PRE_G), vrow(ROW_LN_PRE_B))

    # padded key rows are excluded from every softmax
    kmask = jax.lax.broadcasted_iota(jnp.int32, (H, SEQ_PAD, SEQ_PAD), 2) < SEQ

    # --- transformer: layers unrolled, all weights resident in VMEM ---
    for l in range(n_layers):
        base = ROW_LAYER0 + l * ROWS_PER_LAYER

        # attention branch: x + out_proj(MHA(ln_1(x))); LoRA pre-merged in wrapper
        h = _ln(x, vrow(base + R_LN1_G), vrow(base + R_LN1_B))
        hb = jnp.broadcast_to(h[None], (3 * H, SEQ_PAD, D))
        qkv = jax.lax.dot_general(hb, w_qkvh_ref[l],
                                  (((2,), (1,)), ((0,), (0,))),
                                  preferred_element_type=f32) + b_qkvh_ref[l]
        q, k, v = qkv[0:H], qkv[H:2 * H], qkv[2 * H:3 * H]        # (H, SP, Dh)

        s = jax.lax.dot_general(q, k, (((2,), (2,)), ((0,), (0,))),
                                preferred_element_type=f32)       # (H, SP, SP)
        s = jnp.where(kmask, s, -1e30)
        s = s - jnp.max(s, axis=-1, keepdims=True)
        p = jnp.exp(s)
        p = p * pl.reciprocal(jnp.sum(p, axis=-1, keepdims=True), approx=True)
        o = jax.lax.dot_general(p, v, (((2,), (1,)), ((0,), (0,))),
                                preferred_element_type=f32)       # (H, SP, Dh)
        attn = jax.lax.dot_general(o, w_out_ref[l],
                                   (((2,), (1,)), ((0,), (0,))),
                                   preferred_element_type=f32)    # (H, SP, D)
        x = x + jnp.sum(attn, axis=0) + vrow(base + R_OUT_B)

        # MLP branch: x + c_proj(QuickGELU(c_fc(ln_2(x))))
        h2 = _ln(x, vrow(base + R_LN2_G), vrow(base + R_LN2_B))
        h2 = jnp.dot(h2, w_fc_ref[l], preferred_element_type=f32) \
            + vrow(base + R_FC_B, MLP_DIM)
        h2 = h2 * jax.nn.sigmoid(1.702 * h2)                      # QuickGELU
        x = x + jnp.dot(h2, w_proj_ref[l], preferred_element_type=f32) \
            + vrow(base + R_PROJ_B)

    # --- ln_post ---
    o_ref[0] = _ln(x, vrow(ROW_LN_POST_G), vrow(ROW_LN_POST_B)).astype(o_ref.dtype)


# ---------------- parameter init (deterministic, synthetic) ----------------
def init_params(key):
    def nrm(k, shape, scl=0.02):
        return (scl * jax.random.normal(k, shape)).astype(DTYPE)

    keys = jax.random.split(key, 4 + 12 * LAYERS)
    ki = iter(keys)
    params = {
        # conv1 weight stored as (C*P*P, D) == PyTorch (D, C, P, P) flattened + T
        "conv_w": nrm(next(ki), (PATCH_DIM, WIDTH)),
        "class_emb": nrm(next(ki), (1, WIDTH)),
        "pos_emb": nrm(next(ki), (SEQ, WIDTH)),
        "ln_pre_g": jnp.ones((1, WIDTH), DTYPE),
        "ln_pre_b": jnp.zeros((1, WIDTH), DTYPE),
        "ln_post_g": jnp.ones((1, WIDTH), DTYPE),
        "ln_post_b": jnp.zeros((1, WIDTH), DTYPE),
        "layers": [],
    }
    for _ in range(LAYERS):
        lp = {
            "ln1_g": jnp.ones((1, WIDTH), DTYPE),
            "ln1_b": jnp.zeros((1, WIDTH), DTYPE),
            # PyTorch (3D, D) stored transposed as (D, 3D)  (x @ W form)
            "in_proj_w": nrm(next(ki), (WIDTH, 3 * WIDTH)),
            "in_proj_b": nrm(next(ki), (1, 3 * WIDTH)),
            "out_w": nrm(next(ki), (WIDTH, WIDTH)),
            "out_b": nrm(next(ki), (1, WIDTH)),
            # LoRA on out_proj (PEFT zero-inits lora_B; nonzero here so the
            # LoRA path is numerically exercised)
            "lora_a": nrm(next(ki), (WIDTH, RANK)),
            "lora_b": nrm(next(ki), (RANK, WIDTH)),
            "ln2_g": jnp.ones((1, WIDTH), DTYPE),
            "ln2_b": jnp.zeros((1, WIDTH), DTYPE),
            "fc_w": nrm(next(ki), (WIDTH, MLP_DIM)),
            "fc_b": nrm(next(ki), (1, MLP_DIM)),
            "proj_w": nrm(next(ki), (MLP_DIM, WIDTH)),
            "proj_b": nrm(next(ki), (1, WIDTH)),
        }
        params["layers"].append(lp)
    return params


# ---------------- wrapper-side packing (layout-only, weight prep) ----------------
def _pack_params(params):
    D, H, Dh = WIDTH, HEADS, HEAD_DIM
    q_scale = 1.0 / math.sqrt(Dh)
    lora_scale = LORA_ALPHA / RANK

    def pad_lane(v):
        return jnp.pad(v, ((0, 0), (0, LANE - v.shape[1])))

    pos = params["pos_emb"]                                     # (SEQ, D)
    emb = jnp.concatenate(
        [params["class_emb"] + pos[0:1],                        # cls + pos[0]
         pos[1:SEQ],
         jnp.zeros((SEQ_PAD - SEQ, D), DTYPE)], axis=0)         # (SEQ_PAD, D)

    rows = [pad_lane(emb),
            pad_lane(params["ln_pre_g"]), pad_lane(params["ln_pre_b"]),
            pad_lane(params["ln_post_g"]), pad_lane(params["ln_post_b"])]
    for lp in params["layers"]:
        rows += [pad_lane(lp["ln1_g"]), pad_lane(lp["ln1_b"]),
                 pad_lane(lp["ln2_g"]), pad_lane(lp["ln2_b"]),
                 pad_lane(lp["out_b"]), pad_lane(lp["proj_b"]),
                 pad_lane(lp["fc_b"])]
    vec = jnp.concatenate(rows, axis=0)
    vec = jnp.pad(vec, ((0, VEC_ROWS - vec.shape[0]), (0, 0)))  # (VEC_ROWS, 128)

    w_qkvh, b_qkvh, w_out, w_fc, w_proj = [], [], [], [], []
    for lp in params["layers"]:
        wi, bi = lp["in_proj_w"], lp["in_proj_b"]               # (D, 3D), (1, 3D)
        per_w, per_b = [], []
        for t, fac in ((0, q_scale), (1, 1.0), (2, 1.0)):       # q pre-scaled
            w_t = wi[:, t * D:(t + 1) * D] * fac                # (D, D)
            b_t = bi[:, t * D:(t + 1) * D] * fac                # (1, D)
            per_w.append(w_t.reshape(D, H, Dh).transpose(1, 0, 2))   # (H, D, Dh)
            per_b.append(b_t.reshape(H, 1, Dh))                      # (H, 1, Dh)
        w_qkvh.append(jnp.concatenate(per_w, axis=0))           # (3H, D, Dh)
        b_qkvh.append(jnp.concatenate(per_b, axis=0))           # (3H, 1, Dh)

        # LoRA merged into out_proj once per call (hoisted out of the kernel)
        # TODO(synk): lora_dropout omitted (forward runs under @torch.no_grad).
        w_eff = lp["out_w"] + lora_scale * (lp["lora_a"] @ lp["lora_b"])  # (D, D)
        w_out.append(w_eff.reshape(H, Dh, D))                   # per-head row blocks
        w_fc.append(lp["fc_w"])
        w_proj.append(lp["proj_w"])

    return dict(vec=vec,
                w_qkvh=jnp.stack(w_qkvh), b_qkvh=jnp.stack(b_qkvh),
                w_out=jnp.stack(w_out), w_fc=jnp.stack(w_fc),
                w_proj=jnp.stack(w_proj))


# ---------------- forward wrapper (layout-only XLA, one pallas_call) --------
def clip_with_lora_forward(params, images):
    """images: NCHW (B, 3, H, W) float32 -> patch tokens (B, SEQ, WIDTH)."""
    B, C, Hi, Wi = images.shape
    p = PATCH
    gh, gw = Hi // p, Wi // p
    n_patches = gh * gw
    assert n_patches == N_PATCHES and C == CHANNELS

    # patchify (pure layout): flatten order (C, ph, pw) matches conv_w layout
    patches = images.reshape(B, C, gh, p, gw, p)
    patches = patches.transpose(0, 2, 4, 1, 3, 5).reshape(B, n_patches, C * p * p)

    packed = _pack_params(params)   # TODO(synk): cache packed weights across calls
    conv_w = params["conv_w"]

    vmem = pltpu.MemorySpace.VMEM

    def full_spec(arr):
        if arr.ndim == 2:
            imap = lambda b: (0, 0)
        elif arr.ndim == 3:
            imap = lambda b: (0, 0, 0)
        else:
            imap = lambda b: (0, 0, 0, 0)
        return pl.BlockSpec(arr.shape, imap, memory_space=vmem)

    kernel = functools.partial(_clip_tower_kernel, n_layers=LAYERS)
    out = pl.pallas_call(
        kernel,
        grid=(B,),
        out_shape=jax.ShapeDtypeStruct((B, SEQ_PAD, WIDTH), DTYPE),
        in_specs=[
            pl.BlockSpec((1, n_patches, C * p * p), lambda b: (b, 0, 0),
                         memory_space=vmem),
            full_spec(conv_w),
            full_spec(packed["vec"]),
            full_spec(packed["w_qkvh"]),
            full_spec(packed["b_qkvh"]),
            full_spec(packed["w_out"]),
            full_spec(packed["w_fc"]),
            full_spec(packed["w_proj"]),
        ],
        out_specs=pl.BlockSpec((1, SEQ_PAD, WIDTH), lambda b: (b, 0, 0),
                               memory_space=vmem),
        compiler_params=pltpu.CompilerParams(
            dimension_semantics=("parallel",)),
    )(patches, conv_w, packed["vec"], packed["w_qkvh"], packed["b_qkvh"],
      packed["w_out"], packed["w_fc"], packed["w_proj"])

    return out[:, :SEQ, :]          # drop the padded rows


if __name__ == "__main__":
    root = jax.random.PRNGKey(0)
    k_img, k_par = jax.random.split(root)
    images = jax.random.normal(k_img, (2, CHANNELS, IMAGE, IMAGE), dtype=DTYPE)
    params = init_params(k_par)

    fwd = jax.jit(clip_with_lora_forward)
    out = fwd(params, images)
    jax.block_until_ready(out)
    assert out.shape == (2, SEQ, WIDTH)
    assert out.dtype == DTYPE
    assert bool(jnp.all(jnp.isfinite(out)))
    print("KERNEL_OK")
</pallas_src>

<mosaic_0001>
module attributes {stable_mosaic.version = 11 : i64} {
  func.func @_clip_tower_kernel(%arg0: i32, %arg1: memref<1x4x192xf32, #tpu.memory_space<vmem>>, %arg2: memref<192x32xf32, #tpu.memory_space<vmem>>, %arg3: memref<32x128xf32, #tpu.memory_space<vmem>>, %arg4: memref<2x12x32x8xf32, #tpu.memory_space<vmem>>, %arg5: memref<2x12x1x8xf32, #tpu.memory_space<vmem>>, %arg6: memref<2x4x8x32xf32, #tpu.memory_space<vmem>>, %arg7: memref<2x32x128xf32, #tpu.memory_space<vmem>>, %arg8: memref<2x128x32xf32, #tpu.memory_space<vmem>>, %arg9: memref<1x8x32xf32, #tpu.memory_space<vmem>>) attributes {dimension_semantics = [#tpu.dimension_semantics<parallel>], iteration_bounds = array<i64: 2>, scalar_prefetch = 0 : i64, scratch_operands = 0 : i64, tpu.core_type = #tpu.core_type<tc>, window_params = [{transform_indices = @transform_0, window_bounds = array<i64: 1, 4, 192>}, {pipeline_mode = #tpu.pipeline_mode<synchronous>, transform_indices = @transform_1, window_bounds = array<i64: 192, 32>}, {pipeline_mode = #tpu.pipeline_mode<synchronous>, transform_indices = @transform_2, window_bounds = array<i64: 32, 128>}, {pipeline_mode = #tpu.pipeline_mode<synchronous>, transform_indices = @transform_3, window_bounds = array<i64: 2, 12, 32, 8>}, {pipeline_mode = #tpu.pipeline_mode<synchronous>, transform_indices = @transform_4, window_bounds = array<i64: 2, 12, 1, 8>}, {pipeline_mode = #tpu.pipeline_mode<synchronous>, transform_indices = @transform_5, window_bounds = array<i64: 2, 4, 8, 32>}, {pipeline_mode = #tpu.pipeline_mode<synchronous>, transform_indices = @transform_6, window_bounds = array<i64: 2, 32, 128>}, {pipeline_mode = #tpu.pipeline_mode<synchronous>, transform_indices = @transform_7, window_bounds = array<i64: 2, 128, 32>}, {transform_indices = @transform_8, window_bounds = array<i64: 1, 8, 32>}]} {
    %c0 = arith.constant 0 : index
    %c0_0 = arith.constant 0 : index
    %0 = vector.load %arg3[%c0, %c0_0] : memref<32x128xf32, #tpu.memory_space<vmem>>, vector<32x128xf32>
    %c0_1 = arith.constant 0 : index
    %c0_2 = arith.constant 0 : index
    %c0_3 = arith.constant 0 : index
    %1 = vector.load %arg1[%c0_1, %c0_2, %c0_3] : memref<1x4x192xf32, #tpu.memory_space<vmem>>, vector<1x4x192xf32>
    %2 = vector.shape_cast %1 : vector<1x4x192xf32> to vector<4x192xf32>
    %c0_4 = arith.constant 0 : index
    %c0_5 = arith.constant 0 : index
    %3 = vector.load %arg2[%c0_4, %c0_5] : memref<192x32xf32, #tpu.memory_space<vmem>>, vector<192x32xf32>
    %cst = arith.constant dense<0.000000e+00> : vector<4x32xf32>
    %4 = tpu.matmul %2, %3, %cst {dimension_numbers = #tpu.dot_dimension_numbers<[1], [0], [0], [1], [0, 0, 1, 1], [], []>} : vector<4x192xf32>, vector<192x32xf32>, vector<4x32xf32> -> vector<4x32xf32>
    %5 = tpu.iota {dimensions = array<i32: 0>} : vector<8x4xi32>
    %6 = tpu.iota {dimensions = array<i32: 1>} : vector<8x4xi32>
    %c1_i32 = arith.constant 1 : i32
    %7 = vector.broadcast %c1_i32 : i32 to vector<8x4xi32>
    %8 = arith.addi %6, %7 : vector<8x4xi32>
    %9 = arith.cmpi eq, %5, %8 : vector<8x4xi32>
    %10 = arith.extui %9 : vector<8x4xi1> to vector<8x4xi32>
    %11 = arith.sitofp %10 : vector<8x4xi32> to vector<8x4xf32>
    %cst_6 = arith.constant dense<0.000000e+00> : vector<8x32xf32>
    %12 = tpu.matmul %11, %4, %cst_6 {dimension_numbers = #tpu.dot_dimension_numbers<[1], [0], [0], [1], [0, 0, 1, 1], [], []>} : vector<8x4xf32>, vector<4x32xf32>, vector<8x32xf32> -> vector<8x32xf32>
    %13 = vector.extract_strided_slice %0 {offsets = [0, 0], sizes = [8, 32], strides = [1, 1]} : vector<32x128xf32> to vector<8x32xf32>
    %14 = arith.addf %12, %13 : vector<8x32xf32>
    %15 = vector.extract_strided_slice %0 {offsets = [8, 0], sizes = [1, 32], strides = [1, 1]} : vector<32x128xf32> to vector<1x32xf32>
    %16 = vector.extract_strided_slice %0 {offsets = [9, 0], sizes = [1, 32], strides = [1, 1]} : vector<32x128xf32> to vector<1x32xf32>
    %cst_7 = arith.constant dense<0.000000e+00> : vector<8xf32>
    %17 = vector.multi_reduction <add>, %14, %cst_7 [1] : vector<8x32xf32> to vector<8xf32>
    %18 = vector.shape_cast %17 : vector<8xf32> to vector<8x1xf32>
    %cst_8 = arith.constant 3.200000e+01 : f32
    %19 = vector.broadcast %cst_8 : f32 to vector<8x1xf32>
    %20 = arith.divf %18, %19 : vector<8x1xf32>
    %21 = vector.broadcast %20 : vector<8x1xf32> to vector<8x32xf32>
    %22 = arith.subf %14, %21 : vector<8x32xf32>
    %23 = arith.mulf %22, %22 : vector<8x32xf32>
    %cst_9 = arith.constant dense<0.000000e+00> : vector<8xf32>
    %24 = vector.multi_reduction <add>, %23, %cst_9 [1] : vector<8x32xf32> to vector<8xf32>
    %25 = vector.shape_cast %24 : vector<8xf32> to vector<8x1xf32>
    %cst_10 = arith.constant 3.200000e+01 : f32
    %26 = vector.broadcast %cst_10 : f32 to vector<8x1xf32>
    %27 = arith.divf %25, %26 : vector<8x1xf32>
    %28 = vector.broadcast %20 : vector<8x1xf32> to vector<8x32xf32>
    %29 = arith.subf %14, %28 : vector<8x32xf32>
    %cst_11 = arith.constant 9.99999974E-6 : f32
    %30 = vector.broadcast %cst_11 : f32 to vector<8x1xf32>
    %31 = arith.addf %27, %30 : vector<8x1xf32>
    %32 = math.rsqrt %31 : vector<8x1xf32>
    %33 = vector.broadcast %32 : vector<8x1xf32> to vector<8x32xf32>
    %34 = arith.mulf %29, %33 : vector<8x32xf32>
    %35 = vector.broadcast %15 : vector<1x32xf32> to vector<8x32xf32>
    %36 = arith.mulf %34, %35 : vector<8x32xf32>
    %37 = vector.broadcast %16 : vector<1x32xf32> to vector<8x32xf32>
    %38 = arith.addf %36, %37 : vector<8x32xf32>
    %39 = tpu.iota {dimensions = array<i32: 2>} : vector<4x8x8xi32>
    %c5_i32 = arith.constant 5 : i32
    %40 = vector.broadcast %c5_i32 : i32 to vector<4x8x8xi32>
    %41 = arith.cmpi slt, %39, %40 : vector<4x8x8xi32>
    %42 = vector.extract_strided_slice %0 {offsets = [12, 0], sizes = [1, 32], strides = [1, 1]} : vector<32x128xf32> to vector<1x32xf32>
    %43 = vector.extract_strided_slice %0 {offsets = [13, 0], sizes = [1, 32], strides = [1, 1]} : vector<32x128xf32> to vector<1x32xf32>
    %cst_12 = arith.constant dense<0.000000e+00> : vector<8xf32>
    %44 = vector.multi_reduction <add>, %38, %cst_12 [1] : vector<8x32xf32> to vector<8xf32>
    %45 = vector.shape_cast %44 : vector<8xf32> to vector<8x1xf32>
    %cst_13 = arith.constant 3.200000e+01 : f32
    %46 = vector.broadcast %cst_13 : f32 to vector<8x1xf32>
    %47 = arith.divf %45, %46 : vector<8x1xf32>
    %48 = vector.broadcast %47 : vector<8x1xf32> to vector<8x32xf32>
    %49 = arith.subf %38, %48 : vector<8x32xf32>
    %50 = arith.mulf %49, %49 : vector<8x32xf32>
    %cst_14 = arith.constant dense<0.000000e+00> : vector<8xf32>
    %51 = vector.multi_reduction <add>, %50, %cst_14 [1] : vector<8x32xf32> to vector<8xf32>
    %52 = vector.shape_cast %51 : vector<8xf32> to vector<8x1xf32>
    %cst_15 = arith.constant 3.200000e+01 : f32
    %53 = vector.broadcast %cst_15 : f32 to vector<8x1xf32>
    %54 = arith.divf %52, %53 : vector<8x1xf32>
    %55 = vector.broadcast %47 : vector<8x1xf32> to vector<8x32xf32>
    %56 = arith.subf %38, %55 : vector<8x32xf32>
    %cst_16 = arith.constant 9.99999974E-6 : f32
    %57 = vector.broadcast %cst_16 : f32 to vector<8x1xf32>
    %58 = arith.addf %54, %57 : vector<8x1xf32>
    %59 = math.rsqrt %58 : vector<8x1xf32>
    %60 = vector.broadcast %59 : vector<8x1xf32> to vector<8x32xf32>
    %61 = arith.mulf %56, %60 : vector<8x32xf32>
    %62 = vector.broadcast %42 : vector<1x32xf32> to vector<8x32xf32>
    %63 = arith.mulf %61, %62 : vector<8x32xf32>
    %64 = vector.broadcast %43 : vector<1x32xf32> to vector<8x32xf32>
    %65 = arith.addf %63, %64 : vector<8x32xf32>
    %66 = vector.shape_cast %65 : vector<8x32xf32> to vector<1x8x32xf32>
    %67 = vector.shape_cast %66 : vector<1x8x32xf32> to vector<1x8x32xf32>
    %68 = vector.broadcast %67 : vector<1x8x32xf32> to vector<12x8x32xf32>
    %c0_17 = arith.constant 0 : index
    %c0_18 = arith.constant 0 : index
    %c0_19 = arith.constant 0 : index
    %c0_20 = arith.constant 0 : index
    %69 = vector.load %arg4[%c0_17, %c0_18, %c0_19, %c0_20] : memref<2x12x32x8xf32, #tpu.memory_space<vmem>>, vector<1x12x32x8xf32>
    %70 = vector.shape_cast %69 : vector<1x12x32x8xf32> to vector<12x32x8xf32>
    %cst_21 = arith.constant dense<0.000000e+00> : vector<12x8x8xf32>
    %71 = tpu.matmul %68, %70, %cst_21 {dimension_numbers = #tpu.dot_dimension_numbers<[2], [1], [1], [2], [0, 0, 0, 1, 1, 2], [0], [0]>} : vector<12x8x32xf32>, vector<12x32x8xf32>, vector<12x8x8xf32> -> vector<12x8x8xf32>
    %c0_22 = arith.constant 0 : index
    %c0_23 = arith.constant 0 : index
    %c0_24 = arith.constant 0 : index
    %c0_25 = arith.constant 0 : index
    %72 = vector.load %arg5[%c0_22, %c0_23, %c0_24, %c0_25] : memref<2x12x1x8xf32, #tpu.memory_space<vmem>>, vector<1x12x1x8xf32>
    %73 = vector.shape_cast %72 : vector<1x12x1x8xf32> to vector<12x1x8xf32>
    %74 = vector.broadcast %73 : vector<12x1x8xf32> to vector<12x8x8xf32>
    %75 = arith.addf %71, %74 : vector<12x8x8xf32>
    %76 = vector.extract_strided_slice %75 {offsets = [0, 0, 0], sizes = [4, 8, 8], strides = [1, 1, 1]} : vector<12x8x8xf32> to vector<4x8x8xf32>
    %77 = vector.extract_strided_slice %75 {offsets = [4, 0, 0], sizes = [4, 8, 8], strides = [1, 1, 1]} : vector<12x8x8xf32> to vector<4x8x8xf32>
    %78 = vector.extract_strided_slice %75 {offsets = [8, 0, 0], sizes = [4, 8, 8], strides = [1, 1, 1]} : vector<12x8x8xf32> to vector<4x8x8xf32>
    %cst_26 = arith.constant dense<0.000000e+00> : vector<4x8x8xf32>
    %79 = tpu.matmul %76, %77, %cst_26 {dimension_numbers = #tpu.dot_dimension_numbers<[2], [2], [1], [1], [0, 0, 0, 1, 1, 1], [0], [0]>} : vector<4x8x8xf32>, vector<4x8x8xf32>, vector<4x8x8xf32> -> vector<4x8x8xf32>
    %cst_27 = arith.constant -1.000000e+30 : f32
    %80 = vector.broadcast %cst_27 : f32 to vector<4x8x8xf32>
    %81 = arith.select %41, %79, %80 : vector<4x8x8xi1>, vector<4x8x8xf32>
    %cst_28 = arith.constant dense<0xFF800000> : vector<4x8xf32>
    %82 = vector.multi_reduction <maximumf>, %81, %cst_28 [2] : vector<4x8x8xf32> to vector<4x8xf32>
    %83 = vector.shape_cast %82 : vector<4x8xf32> to vector<4x8x1xf32>
    %84 = vector.broadcast %83 : vector<4x8x1xf32> to vector<4x8x8xf32>
    %85 = arith.subf %81, %84 : vector<4x8x8xf32>
    %86 = math.exp %85 : vector<4x8x8xf32>
    %cst_29 = arith.constant dense<0.000000e+00> : vector<4x8xf32>
    %87 = vector.multi_reduction <add>, %86, %cst_29 [2] : vector<4x8x8xf32> to vector<4x8xf32>
    %88 = vector.shape_cast %87 : vector<4x8xf32> to vector<4x8x1xf32>
    %89 = tpu.reciprocal %88 {approx = true} : vector<4x8x1xf32> -> vector<4x8x1xf32>
    %90 = vector.broadcast %89 : vector<4x8x1xf32> to vector<4x8x8xf32>
    %91 = arith.mulf %86, %90 : vector<4x8x8xf32>
    %cst_30 = arith.constant dense<0.000000e+00> : vector<4x8x8xf32>
    %92 = tpu.matmul %91, %78, %cst_30 {dimension_numbers = #tpu.dot_dimension_numbers<[2], [1], [1], [2], [0, 0, 0, 1, 1, 2], [0], [0]>} : vector<4x8x8xf32>, vector<4x8x8xf32>, vector<4x8x8xf32> -> vector<4x8x8xf32>
    %c0_31 = arith.constant 0 : index
    %c0_32 = arith.constant 0 : index
    %c0_33 = arith.constant 0 : index
    %c0_34 = arith.constant 0 : index
    %93 = vector.load %arg6[%c0_31, %c0_32, %c0_33, %c0_34] : memref<2x4x8x32xf32, #tpu.memory_space<vmem>>, vector<1x4x8x32xf32>
    %94 = vector.shape_cast %93 : vector<1x4x8x32xf32> to vector<4x8x32xf32>
    %cst_35 = arith.constant dense<0.000000e+00> : vector<4x8x32xf32>
    %95 = tpu.matmul %92, %94, %cst_35 {dimension_numbers = #tpu.dot_dimension_numbers<[2], [1], [1], [2], [0, 0, 0, 1, 1, 2], [0], [0]>} : vector<4x8x8xf32>, vector<4x8x32xf32>, vector<4x8x32xf32> -> vector<4x8x32xf32>
    %cst_36 = arith.constant dense<0.000000e+00> : vector<8x32xf32>
    %96 = vector.multi_reduction <add>, %95, %cst_36 [0] : vector<4x8x32xf32> to vector<8x32xf32>
    %97 = arith.addf %38, %96 : vector<8x32xf32>
    %98 = vector.extract_strided_slice %0 {offsets = [16, 0], sizes = [1, 32], strides = [1, 1]} : vector<32x128xf32> to vector<1x32xf32>
    %99 = vector.broadcast %98 : vector<1x32xf32> to vector<8x32xf32>
    %100 = arith.addf %97, %99 : vector<8x32xf32>
    %101 = vector.extract_strided_slice %0 {offsets = [14, 0], sizes = [1, 32], strides = [1, 1]} : vector<32x128xf32> to vector<1x32xf32>
    %102 = vector.extract_strided_slice %0 {offsets = [15, 0], sizes = [1, 32], strides = [1, 1]} : vector<32x128xf32> to vector<1x32xf32>
    %cst_37 = arith.constant dense<0.000000e+00> : vector<8xf32>
    %103 = vector.multi_reduction <add>, %100, %cst_37 [1] : vector<8x32xf32> to vector<8xf32>
    %104 = vector.shape_cast %103 : vector<8xf32> to vector<8x1xf32>
    %cst_38 = arith.constant 3.200000e+01 : f32
    %105 = vector.broadcast %cst_38 : f32 to vector<8x1xf32>
    %106 = arith.divf %104, %105 : vector<8x1xf32>
    %107 = vector.broadcast %106 : vector<8x1xf32> to vector<8x32xf32>
    %108 = arith.subf %100, %107 : vector<8x32xf32>
    %109 = arith.mulf %108, %108 : vector<8x32xf32>
    %cst_39 = arith.constant dense<0.000000e+00> : vector<8xf32>
    %110 = vector.multi_reduction <add>, %109, %cst_39 [1] : vector<8x32xf32> to vector<8xf32>
    %111 = vector.shape_cast %110 : vector<8xf32> to vector<8x1xf32>
    %cst_40 = arith.constant 3.200000e+01 : f32
    %112 = vector.broadcast %cst_40 : f32 to vector<8x1xf32>
    %113 = arith.divf %111, %112 : vector<8x1xf32>
    %114 = vector.broadcast %106 : vector<8x1xf32> to vector<8x32xf32>
    %115 = arith.subf %100, %114 : vector<8x32xf32>
    %cst_41 = arith.constant 9.99999974E-6 : f32
    %116 = vector.broadcast %cst_41 : f32 to vector<8x1xf32>
    %117 = arith.addf %113, %116 : vector<8x1xf32>
    %118 = math.rsqrt %117 : vector<8x1xf32>
    %119 = vector.broadcast %118 : vector<8x1xf32> to vector<8x32xf32>
    %120 = arith.mulf %115, %119 : vector<8x32xf32>
    %121 = vector.broadcast %101 : vector<1x32xf32> to vector<8x32xf32>
    %122 = arith.mulf %120, %121 : vector<8x32xf32>
    %123 = vector.broadcast %102 : vector<1x32xf32> to vector<8x32xf32>
    %124 = arith.addf %122, %123 : vector<8x32xf32>
    %c0_42 = arith.constant 0 : index
    %c0_43 = arith.constant 0 : index
    %c0_44 = arith.constant 0 : index
    %125 = vector.load %arg7[%c0_42, %c0_43, %c0_44] : memref<2x32x128xf32, #tpu.memory_space<vmem>>, vector<1x32x128xf32>
    %126 = vector.shape_cast %125 : vector<1x32x128xf32> to vector<32x128xf32>
    %cst_45 = arith.constant dense<0.000000e+00> : vector<8x128xf32>
    %127 = tpu.matmul %124, %126, %cst_45 {dimension_numbers = #tpu.dot_dimension_numbers<[1], [0], [0], [1], [0, 0, 1, 1], [], []>} : vector<8x32xf32>, vector<32x128xf32>, vector<8x128xf32> -> vector<8x128xf32>
    %128 = vector.extract_strided_slice %0 {offsets = [18, 0], sizes = [1, 128], strides = [1, 1]} : vector<32x128xf32> to vector<1x128xf32>
    %129 = vector.broadcast %128 : vector<1x128xf32> to vector<8x128xf32>
    %130 = arith.addf %127, %129 : vector<8x128xf32>
    %cst_46 = arith.constant 1.702000e+00 : f32
    %131 = vector.broadcast %cst_46 : f32 to vector<8x128xf32>
    %132 = arith.mulf %131, %130 : vector<8x128xf32>
    %133 = arith.negf %132 : vector<8x128xf32>
    %134 = math.exp %133 : vector<8x128xf32>
    %cst_47 = arith.constant 1.000000e+00 : f32
    %135 = vector.broadcast %cst_47 : f32 to vector<8x128xf32>
    %136 = arith.addf %135, %134 : vector<8x128xf32>
    %137 = arith.divf %135, %136 : vector<8x128xf32>
    %138 = arith.mulf %130, %137 : vector<8x128xf32>
    %c0_48 = arith.constant 0 : index
    %c0_49 = arith.constant 0 : index
    %c0_50 = arith.constant 0 : index
    %139 = vector.load %arg8[%c0_48, %c0_49, %c0_50] : memref<2x128x32xf32, #tpu.memory_space<vmem>>, vector<1x128x32xf32>
    %140 = vector.shape_cast %139 : vector<1x128x32xf32> to vector<128x32xf32>
    %cst_51 = arith.constant dense<0.000000e+00> : vector<8x32xf32>
    %141 = tpu.matmul %138, %140, %cst_51 {dimension_numbers = #tpu.dot_dimension_numbers<[1], [0], [0], [1], [0, 0, 1, 1], [], []>} : vector<8x128xf32>, vector<128x32xf32>, vector<8x32xf32> -> vector<8x32xf32>
    %142 = arith.addf %100, %141 : vector<8x32xf32>
    %143 = vector.extract_strided_slice %0 {offsets = [17, 0], sizes = [1, 32], strides = [1, 1]} : vector<32x128xf32> to vector<1x32xf32>
    %144 = vector.broadcast %143 : vector<1x32xf32> to vector<8x32xf32>
    %145 = arith.addf %142, %144 : vector<8x32xf32>
    %146 = vector.extract_strided_slice %0 {offsets = [19, 0], sizes = [1, 32], strides = [1, 1]} : vector<32x128xf32> to vector<1x32xf32>
    %147 = vector.extract_strided_slice %0 {offsets = [20, 0], sizes = [1, 32], strides = [1, 1]} : vector<32x128xf32> to vector<1x32xf32>
    %cst_52 = arith.constant dense<0.000000e+00> : vector<8xf32>
    %148 = vector.multi_reduction <add>, %145, %cst_52 [1] : vector<8x32xf32> to vector<8xf32>
    %149 = vector.shape_cast %148 : vector<8xf32> to vector<8x1xf32>
    %cst_53 = arith.constant 3.200000e+01 : f32
    %150 = vector.broadcast %cst_53 : f32 to vector<8x1xf32>
    %151 = arith.divf %149, %150 : vector<8x1xf32>
    %152 = vector.broadcast %151 : vector<8x1xf32> to vector<8x32xf32>
    %153 = arith.subf %145, %152 : vector<8x32xf32>
    %154 = arith.mulf %153, %153 : vector<8x32xf32>
    %cst_54 = arith.constant dense<0.000000e+00> : vector<8xf32>
    %155 = vector.multi_reduction <add>, %154, %cst_54 [1] : vector<8x32xf32> to vector<8xf32>
    %156 = vector.shape_cast %155 : vector<8xf32> to vector<8x1xf32>
    %cst_55 = arith.constant 3.200000e+01 : f32
    %157 = vector.broadcast %cst_55 : f32 to vector<8x1xf32>
    %158 = arith.divf %156, %157 : vector<8x1xf32>
    %159 = vector.broadcast %151 : vector<8x1xf32> to vector<8x32xf32>
    %160 = arith.subf %145, %159 : vector<8x32xf32>
    %cst_56 = arith.constant 9.99999974E-6 : f32
    %161 = vector.broadcast %cst_56 : f32 to vector<8x1xf32>
    %162 = arith.addf %158, %161 : vector<8x1xf32>
    %163 = math.rsqrt %162 : vector<8x1xf32>
    %164 = vector.broadcast %163 : vector<8x1xf32> to vector<8x32xf32>
    %165 = arith.mulf %160, %164 : vector<8x32xf32>
    %166 = vector.broadcast %146 : vector<1x32xf32> to vector<8x32xf32>
    %167 = arith.mulf %165, %166 : vector<8x32xf32>
    %168 = vector.broadcast %147 : vector<1x32xf32> to vector<8x32xf32>
    %169 = arith.addf %167, %168 : vector<8x32xf32>
    %170 = vector.shape_cast %169 : vector<8x32xf32> to vector<1x8x32xf32>
    %171 = vector.shape_cast %170 : vector<1x8x32xf32> to vector<1x8x32xf32>
    %172 = vector.broadcast %171 : vector<1x8x32xf32> to vector<12x8x32xf32>
    %c1 = arith.constant 1 : index
    %c0_57 = arith.constant 0 : index
    %c0_58 = arith.constant 0 : index
    %c0_59 = arith.constant 0 : index
    %173 = vector.load %arg4[%c1, %c0_57, %c0_58, %c0_59] : memref<2x12x32x8xf32, #tpu.memory_space<vmem>>, vector<1x12x32x8xf32>
    %174 = vector.shape_cast %173 : vector<1x12x32x8xf32> to vector<12x32x8xf32>
    %cst_60 = arith.constant dense<0.000000e+00> : vector<12x8x8xf32>
    %175 = tpu.matmul %172, %174, %cst_60 {dimension_numbers = #tpu.dot_dimension_numbers<[2], [1], [1], [2], [0, 0, 0, 1, 1, 2], [0], [0]>} : vector<12x8x32xf32>, vector<12x32x8xf32>, vector<12x8x8xf32> -> vector<12x8x8xf32>
    %c1_61 = arith.constant 1 : index
    %c0_62 = arith.constant 0 : index
    %c0_63 = arith.constant 0 : index
    %c0_64 = arith.constant 0 : index
    %176 = vector.load %arg5[%c1_61, %c0_62, %c0_63, %c0_64] : memref<2x12x1x8xf32, #tpu.memory_space<vmem>>, vector<1x12x1x8xf32>
    %177 = vector.shape_cast %176 : vector<1x12x1x8xf32> to vector<12x1x8xf32>
    %178 = vector.broadcast %177 : vector<12x1x8xf32> to vector<12x8x8xf32>
    %179 = arith.addf %175, %178 : vector<12x8x8xf32>
    %180 = vector.extract_strided_slice %179 {offsets = [0, 0, 0], sizes = [4, 8, 8], strides = [1, 1, 1]} : vector<12x8x8xf32> to vector<4x8x8xf32>
    %181 = vector.extract_strided_slice %179 {offsets = [4, 0, 0], sizes = [4, 8, 8], strides = [1, 1, 1]} : vector<12x8x8xf32> to vector<4x8x8xf32>
    %182 = vector.extract_strided_slice %179 {offsets = [8, 0, 0], sizes = [4, 8, 8], strides = [1, 1, 1]} : vector<12x8x8xf32> to vector<4x8x8xf32>
    %cst_65 = arith.constant dense<0.000000e+00> : vector<4x8x8xf32>
    %183 = tpu.matmul %180, %181, %cst_65 {dimension_numbers = #tpu.dot_dimension_numbers<[2], [2], [1], [1], [0, 0, 0, 1, 1, 1], [0], [0]>} : vector<4x8x8xf32>, vector<4x8x8xf32>, vector<4x8x8xf32> -> vector<4x8x8xf32>
    %cst_66 = arith.constant -1.000000e+30 : f32
    %184 = vector.broadcast %cst_66 : f32 to vector<4x8x8xf32>
    %185 = arith.select %41, %183, %184 : vector<4x8x8xi1>, vector<4x8x8xf32>
    %cst_67 = arith.constant dense<0xFF800000> : vector<4x8xf32>
    %186 = vector.multi_reduction <maximumf>, %185, %cst_67 [2] : vector<4x8x8xf32> to vector<4x8xf32>
    %187 = vector.shape_cast %186 : vector<4x8xf32> to vector<4x8x1xf32>
    %188 = vector.broadcast %187 : vector<4x8x1xf32> to vector<4x8x8xf32>
    %189 = arith.subf %185, %188 : vector<4x8x8xf32>
    %190 = math.exp %189 : vector<4x8x8xf32>
    %cst_68 = arith.constant dense<0.000000e+00> : vector<4x8xf32>
    %191 = vector.multi_reduction <add>, %190, %cst_68 [2] : vector<4x8x8xf32> to vector<4x8xf32>
    %192 = vector.shape_cast %191 : vector<4x8xf32> to vector<4x8x1xf32>
    %193 = tpu.reciprocal %192 {approx = true} : vector<4x8x1xf32> -> vector<4x8x1xf32>
    %194 = vector.broadcast %193 : vector<4x8x1xf32> to vector<4x8x8xf32>
    %195 = arith.mulf %190, %194 : vector<4x8x8xf32>
    %cst_69 = arith.constant dense<0.000000e+00> : vector<4x8x8xf32>
    %196 = tpu.matmul %195, %182, %cst_69 {dimension_numbers = #tpu.dot_dimension_numbers<[2], [1], [1], [2], [0, 0, 0, 1, 1, 2], [0], [0]>} : vector<4x8x8xf32>, vector<4x8x8xf32>, vector<4x8x8xf32> -> vector<4x8x8xf32>
    %c1_70 = arith.constant 1 : index
    %c0_71 = arith.constant 0 : index
    %c0_72 = arith.constant 0 : index
    %c0_73 = arith.constant 0 : index
    %197 = vector.load %arg6[%c1_70, %c0_71, %c0_72, %c0_73] : memref<2x4x8x32xf32, #tpu.memory_space<vmem>>, vector<1x4x8x32xf32>
    %198 = vector.shape_cast %197 : vector<1x4x8x32xf32> to vector<4x8x32xf32>
    %cst_74 = arith.constant dense<0.000000e+00> : vector<4x8x32xf32>
    %199 = tpu.matmul %196, %198, %cst_74 {dimension_numbers = #tpu.dot_dimension_numbers<[2], [1], [1], [2], [0, 0, 0, 1, 1, 2], [0], [0]>} : vector<4x8x8xf32>, vector<4x8x32xf32>, vector<4x8x32xf32> -> vector<4x8x32xf32>
    %cst_75 = arith.constant dense<0.000000e+00> : vector<8x32xf32>
    %200 = vector.multi_reduction <add>, %199, %cst_75 [0] : vector<4x8x32xf32> to vector<8x32xf32>
    %201 = arith.addf %145, %200 : vector<8x32xf32>
    %202 = vector.extract_strided_slice %0 {offsets = [23, 0], sizes = [1, 32], strides = [1, 1]} : vector<32x128xf32> to vector<1x32xf32>
    %203 = vector.broadcast %202 : vector<1x32xf32> to vector<8x32xf32>
    %204 = arith.addf %201, %203 : vector<8x32xf32>
    %205 = vector.extract_strided_slice %0 {offsets = [21, 0], sizes = [1, 32], strides = [1, 1]} : vector<32x128xf32> to vector<1x32xf32>
    %206 = vector.extract_strided_slice %0 {offsets = [22, 0], sizes = [1, 32], strides = [1, 1]} : vector<32x128xf32> to vector<1x32xf32>
    %cst_76 = arith.constant dense<0.000000e+00> : vector<8xf32>
    %207 = vector.multi_reduction <add>, %204, %cst_76 [1] : vector<8x32xf32> to vector<8xf32>
    %208 = vector.shape_cast %207 : vector<8xf32> to vector<8x1xf32>
    %cst_77 = arith.constant 3.200000e+01 : f32
    %209 = vector.broadcast %cst_77 : f32 to vector<8x1xf32>
    %210 = arith.divf %208, %209 : vector<8x1xf32>
    %211 = vector.broadcast %210 : vector<8x1xf32> to vector<8x32xf32>
    %212 = arith.subf %204, %211 : vector<8x32xf32>
    %213 = arith.mulf %212, %212 : vector<8x32xf32>
    %cst_78 = arith.constant dense<0.000000e+00> : vector<8xf32>
    %214 = vector.multi_reduction <add>, %213, %cst_78 [1] : vector<8x32xf32> to vector<8xf32>
    %215 = vector.shape_cast %214 : vector<8xf32> to vector<8x1xf32>
    %cst_79 = arith.constant 3.200000e+01 : f32
    %216 = vector.broadcast %cst_79 : f32 to vector<8x1xf32>
    %217 = arith.divf %215, %216 : vector<8x1xf32>
    %218 = vector.broadcast %210 : vector<8x1xf32> to vector<8x32xf32>
    %219 = arith.subf %204, %218 : vector<8x32xf32>
    %cst_80 = arith.constant 9.99999974E-6 : f32
    %220 = vector.broadcast %cst_80 : f32 to vector<8x1xf32>
    %221 = arith.addf %217, %220 : vector<8x1xf32>
    %222 = math.rsqrt %221 : vector<8x1xf32>
    %223 = vector.broadcast %222 : vector<8x1xf32> to vector<8x32xf32>
    %224 = arith.mulf %219, %223 : vector<8x32xf32>
    %225 = vector.broadcast %205 : vector<1x32xf32> to vector<8x32xf32>
    %226 = arith.mulf %224, %225 : vector<8x32xf32>
    %227 = vector.broadcast %206 : vector<1x32xf32> to vector<8x32xf32>
    %228 = arith.addf %226, %227 : vector<8x32xf32>
    %c1_81 = arith.constant 1 : index
    %c0_82 = arith.constant 0 : index
    %c0_83 = arith.constant 0 : index
    %229 = vector.load %arg7[%c1_81, %c0_82, %c0_83] : memref<2x32x128xf32, #tpu.memory_space<vmem>>, vector<1x32x128xf32>
    %230 = vector.shape_cast %229 : vector<1x32x128xf32> to vector<32x128xf32>
    %cst_84 = arith.constant dense<0.000000e+00> : vector<8x128xf32>
    %231 = tpu.matmul %228, %230, %cst_84 {dimension_numbers = #tpu.dot_dimension_numbers<[1], [0], [0], [1], [0, 0, 1, 1], [], []>} : vector<8x32xf32>, vector<32x128xf32>, vector<8x128xf32> -> vector<8x128xf32>
    %232 = vector.extract_strided_slice %0 {offsets = [25, 0], sizes = [1, 128], strides = [1, 1]} : vector<32x128xf32> to vector<1x128xf32>
    %233 = vector.broadcast %232 : vector<1x128xf32> to vector<8x128xf32>
    %234 = arith.addf %231, %233 : vector<8x128xf32>
    %cst_85 = arith.constant 1.702000e+00 : f32
    %235 = vector.broadcast %cst_85 : f32 to vector<8x128xf32>
    %236 = arith.mulf %235, %234 : vector<8x128xf32>
    %237 = arith.negf %236 : vector<8x128xf32>
    %238 = math.exp %237 : vector<8x128xf32>
    %cst_86 = arith.constant 1.000000e+00 : f32
    %239 = vector.broadcast %cst_86 : f32 to vector<8x128xf32>
    %240 = arith.addf %239, %238 : vector<8x128xf32>
    %241 = arith.divf %239, %240 : vector<8x128xf32>
    %242 = arith.mulf %234, %241 : vector<8x128xf32>
    %c1_87 = arith.constant 1 : index
    %c0_88 = arith.constant 0 : index
    %c0_89 = arith.constant 0 : index
    %243 = vector.load %arg8[%c1_87, %c0_88, %c0_89] : memref<2x128x32xf32, #tpu.memory_space<vmem>>, vector<1x128x32xf32>
    %244 = vector.shape_cast %243 : vector<1x128x32xf32> to vector<128x32xf32>
    %cst_90 = arith.constant dense<0.000000e+00> : vector<8x32xf32>
    %245 = tpu.matmul %242, %244, %cst_90 {dimension_numbers = #tpu.dot_dimension_numbers<[1], [0], [0], [1], [0, 0, 1, 1], [], []>} : vector<8x128xf32>, vector<128x32xf32>, vector<8x32xf32> -> vector<8x32xf32>
    %246 = arith.addf %204, %245 : vector<8x32xf32>
    %247 = vector.extract_strided_slice %0 {offsets = [24, 0], sizes = [1, 32], strides = [1, 1]} : vector<32x128xf32> to vector<1x32xf32>
    %248 = vector.broadcast %247 : vector<1x32xf32> to vector<8x32xf32>
    %249 = arith.addf %246, %248 : vector<8x32xf32>
    %250 = vector.extract_strided_slice %0 {offsets = [10, 0], sizes = [1, 32], strides = [1, 1]} : vector<32x128xf32> to vector<1x32xf32>
    %251 = vector.extract_strided_slice %0 {offsets = [11, 0], sizes = [1, 32], strides = [1, 1]} : vector<32x128xf32> to vector<1x32xf32>
    %cst_91 = arith.constant dense<0.000000e+00> : vector<8xf32>
    %252 = vector.multi_reduction <add>, %249, %cst_91 [1] : vector<8x32xf32> to vector<8xf32>
    %253 = vector.shape_cast %252 : vector<8xf32> to vector<8x1xf32>
    %cst_92 = arith.constant 3.200000e+01 : f32
    %254 = vector.broadcast %cst_92 : f32 to vector<8x1xf32>
    %255 = arith.divf %253, %254 : vector<8x1xf32>
    %256 = vector.broadcast %255 : vector<8x1xf32> to vector<8x32xf32>
    %257 = arith.subf %249, %256 : vector<8x32xf32>
    %258 = arith.mulf %257, %257 : vector<8x32xf32>
    %cst_93 = arith.constant dense<0.000000e+00> : vector<8xf32>
    %259 = vector.multi_reduction <add>, %258, %cst_93 [1] : vector<8x32xf32> to vector<8xf32>
    %260 = vector.shape_cast %259 : vector<8xf32> to vector<8x1xf32>
    %cst_94 = arith.constant 3.200000e+01 : f32
    %261 = vector.broadcast %cst_94 : f32 to vector<8x1xf32>
    %262 = arith.divf %260, %261 : vector<8x1xf32>
    %263 = vector.broadcast %255 : vector<8x1xf32> to vector<8x32xf32>
    %264 = arith.subf %249, %263 : vector<8x32xf32>
    %cst_95 = arith.constant 9.99999974E-6 : f32
    %265 = vector.broadcast %cst_95 : f32 to vector<8x1xf32>
    %266 = arith.addf %262, %265 : vector<8x1xf32>
    %267 = math.rsqrt %266 : vector<8x1xf32>
    %268 = vector.broadcast %267 : vector<8x1xf32> to vector<8x32xf32>
    %269 = arith.mulf %264, %268 : vector<8x32xf32>
    %270 = vector.broadcast %250 : vector<1x32xf32> to vector<8x32xf32>
    %271 = arith.mulf %269, %270 : vector<8x32xf32>
    %272 = vector.broadcast %251 : vector<1x32xf32> to vector<8x32xf32>
    %273 = arith.addf %271, %272 : vector<8x32xf32>
    %c0_96 = arith.constant 0 : index
    %c0_97 = arith.constant 0 : index
    %c0_98 = arith.constant 0 : index
    %274 = vector.load %arg9[%c0_96, %c0_97, %c0_98] : memref<1x8x32xf32, #tpu.memory_space<vmem>>, vector<1x8x32xf32>
    %275 = vector.shape_cast %274 : vector<1x8x32xf32> to vector<8x32xf32>
    %276 = vector.shape_cast %273 : vector<8x32xf32> to vector<1x8x32xf32>
    tpu.vector_store %arg9[%c0_96, %c0_97, %c0_98], %276 {strides = array<i32>} : memref<1x8x32xf32, #tpu.memory_space<vmem>>, vector<1x8x32xf32>,
    return
  }
  func.func @transform_0(%arg0: i32) -> (i32, i32, i32) {
    %c0_i32 = arith.constant 0 : i32
    %c0_i32_0 = arith.constant 0 : i32
    %c0_i32_1 = arith.constant 0 : i32
    return %arg0, %c0_i32, %c0_i32_0 : i32, i32, i32
  }
  func.func @transform_1(%arg0: i32) -> (i32, i32) {
    %c0_i32 = arith.constant 0 : i32
    %c0_i32_0 = arith.constant 0 : i32
    %c0_i32_1 = arith.constant 0 : i32
    return %c0_i32, %c0_i32_0 : i32, i32
  }
  func.func @transform_2(%arg0: i32) -> (i32, i32) {
    %c0_i32 = arith.constant 0 : i32
    %c0_i32_0 = arith.constant 0 : i32
    %c0_i32_1 = arith.constant 0 : i32
    return %c0_i32, %c0_i32_0 : i32, i32
  }
  func.func @transform_3(%arg0: i32) -> (i32, i32, i32, i32) {
    %c0_i32 = arith.constant 0 : i32
    %c0_i32_0 = arith.constant 0 : i32
    %c0_i32_1 = arith.constant 0 : i32
    %c0_i32_2 = arith.constant 0 : i32
    %c0_i32_3 = arith.constant 0 : i32
    return %c0_i32, %c0_i32_0, %c0_i32_1, %c0_i32_2 : i32, i32, i32, i32
  }
  func.func @transform_4(%arg0: i32) -> (i32, i32, i32, i32) {
    %c0_i32 = arith.constant 0 : i32
    %c0_i32_0 = arith.constant 0 : i32
    %c0_i32_1 = arith.constant 0 : i32
    %c0_i32_2 = arith.constant 0 : i32
    %c0_i32_3 = arith.constant 0 : i32
    return %c0_i32, %c0_i32_0, %c0_i32_1, %c0_i32_2 : i32, i32, i32, i32
  }
  func.func @transform_5(%arg0: i32) -> (i32, i32, i32, i32) {
    %c0_i32 = arith.constant 0 : i32
    %c0_i32_0 = arith.constant 0 : i32
    %c0_i32_1 = arith.constant 0 : i32
    %c0_i32_2 = arith.constant 0 : i32
    %c0_i32_3 = arith.constant 0 : i32
    return %c0_i32, %c0_i32_0, %c0_i32_1, %c0_i32_2 : i32, i32, i32, i32
  }
  func.func @transform_6(%arg0: i32) -> (i32, i32, i32) {
    %c0_i32 = arith.constant 0 : i32
    %c0_i32_0 = arith.constant 0 : i32
    %c0_i32_1 = arith.constant 0 : i32
    %c0_i32_2 = arith.constant 0 : i32
    return %c0_i32, %c0_i32_0, %c0_i32_1 : i32, i32, i32
  }
  func.func @transform_7(%arg0: i32) -> (i32, i32, i32) {
    %c0_i32 = arith.constant 0 : i32
    %c0_i32_0 = arith.constant 0 : i32
    %c0_i32_1 = arith.constant 0 : i32
    %c0_i32_2 = arith.constant 0 : i32
    return %c0_i32, %c0_i32_0, %c0_i32_1 : i32, i32, i32
  }
  func.func @transform_8(%arg0: i32) -> (i32, i32, i32) {
    %c0_i32 = arith.constant 0 : i32
    %c0_i32_0 = arith.constant 0 : i32
    %c0_i32_1 = arith.constant 0 : i32
    return %arg0, %c0_i32, %c0_i32_0 : i32, i32, i32
  }
}

</mosaic_0001>

<bundles_post_ra>
// kernel: clip_with_lora_forward.1
= control target key start
LH: loop header
LB: loop body
LE: loop exit
PB: predicated region body
PF: predicated region fallthrough
CT: control target
= control target key end

     0   :  { %s6152_s27 = smov 0   ;;  %s7217_s0 = inlined_call_operand.vmem [shape: f32[2,4,192], index: 0, kind: input, shape index: {}]   ;;  %s7218_s1 = inlined_call_operand.vmem [shape: f32[192,32], index: 1, kind: input, shape index: {}]   ;;  %s7219_s2 = inlined_call_operand.vmem [shape: f32[32,128], index: 2, kind: input, shape index: {}]   ;;  %s7220_s3 = inlined_call_operand.vmem [shape: f32[2,12,32,8], index: 3, kind: input, shape index: {}]   ;;  %s7221_s4 = inlined_call_operand.vmem [shape: f32[2,12,1,8], index: 4, kind: input, shape index: {}]   ;;  %s7222_s5 = inlined_call_operand.vmem [shape: f32[2,4,8,32], index: 5, kind: input, shape index: {}]   ;;  %s7223_s6 = inlined_call_operand.vmem [shape: f32[2,32,128], index: 6, kind: input, shape index: {}]   ;;  %s7224_s7 = inlined_call_operand.vmem [shape: f32[2,128,32], index: 7, kind: input, shape index: {}]   ;;  %s7225_s8 = inlined_call_operand.vmem [shape: f32[2,8,32], index: 8, kind: output, shape index: {}]  }
   0x1 LB: > { %s4913_s28 = sadd.s32 4294967295, %s6102_s27   ;;  %p4917_p0 = scmp.ge.s32.totalorder %s6102_s27, 1  ;;  %s6102_s27 = sphi %s6152_s27, %s18_s27  }
   0x2   : > { %p262_p1 = scmp.lt.s32.totalorder %s6102_s27, 3 }
   0x4   : > { %p263_p2 = pnand %p4917_p0, %p262_p1 }
   0x5   : > { %v309_v0 = vld [vmem:[%s7218_s1] sm:$0xff] (!%p263_p2)  ;;  %v310_v1 = vld [vmem:[%s7218_s1 + $0x8] sm:$0xff] (!%p263_p2)  ;;  %v311_v2 = vld [vmem:[%s7218_s1 + $0x10] sm:$0xff] (!%p263_p2)  ;;  %p295_p3 = scmp.lt.s32.totalorder (!%p263_p2), %s4913_s28, 1  ;;  %v6104_v3 = vmov (!%p263_p2), 0.0|0.0   ;;  %vm335_vm0 = vcmask (!%p263_p2), 523264   ;;  %v408_v40 = vlaneseq (!%p263_p2) }
   0x6   : > { %266 = sbr.rel (%p263_p2) target bundleno = 5711 (0x164f), region = 52  ;;  %5791 = vmatprep.subr.bf16.mxu0 (!%p263_p2), %v6104_v3  ;;  %v5792_v4 = vpack.c.bf16 (!%p263_p2), %v310_v1, %v309_v0  ;;  %v312_v5 = vld [vmem:[%s7218_s1 + $0x18] sm:$0xff] (!%p263_p2)  ;;  %v313_v7 = vld [vmem:[%s7218_s1 + $0x20] sm:$0xff] (!%p263_p2)  ;;  %v314_v8 = vld [vmem:[%s7218_s1 + $0x28] sm:$0xff] (!%p263_p2)  ;;  %v6105_v39 = vmov (!%p263_p2), 0.0   ;;  %vm6106_vm1 = vmmov (!%p263_p2), 0  }
   0x7   : > { %v5795_v6 = vpack.c.bf16 (!%p263_p2), %v312_v5, %v311_v2  ;;  %v5798_v9 = vpack.c.bf16 (!%p263_p2), %v314_v8, %v313_v7  ;;  %v315_v10 = vld [vmem:[%s7218_s1 + $0x30] sm:$0xff] (!%p263_p2)  ;;  %v316_v11 = vld [vmem:[%s7218_s1 + $0x38] sm:$0xff] (!%p263_p2)  ;;  %v317_v15 = vld [vmem:[%s7218_s1 + $0x40] sm:$0xff] (!%p263_p2)  ;;  %5310 = vmatprep.subr.mxu1 (!%p263_p2), %v6105_v39  ;;  %5312 = vmatprep.mubr.msk.f32.mxu1 (!%p263_p2), %vm6106_vm1, %v6105_v39  ;;  %v6258_v41 = vand.u32 (!%p263_p2), 127, %v408_v40  ;;  %v6260_v42 = vshrl.u32 (!%p263_p2), %v408_v40, 7 }
   0x8   : > { %5793 = vmatpush1.bf16.msra.mxu0 (!%p263_p2), %v5792_v4  ;;  %v5801_v14 = vpack.c.bf16 (!%p263_p2), %v316_v11, %v315_v10  ;;  %v318_v16 = vld [vmem:[%s7218_s1 + $0x48] sm:$0xff] (!%p263_p2)  ;;  %v319_v18 = vld [vmem:[%s7218_s1 + $0x50] sm:$0xff] (!%p263_p2)  ;;  %v320_v19 = vld [vmem:[%s7218_s1 + $0x58] sm:$0xff] (!%p263_p2)  ;;  %vm420_vm3 = vcmask (!%p263_p2), 1043456   ;;  %vm416_vm4 = vcmask (!%p263_p2), 31744   ;;  %vm494_vm5 = vcmask (!%p263_p2), 261120  }
   0x9   : > { %5794 = vmatprep.subr.bf16.mxu0 (!%p263_p2), %v6104_v3  ;;  %v5804_v17 = vpack.c.bf16 (!%p263_p2), %v318_v16, %v317_v15  ;;  %v5807_v20 = vpack.c.bf16 (!%p263_p2), %v320_v19, %v319_v18  ;;  %v321_v21 = vld [vmem:[%s7218_s1 + $0x60] sm:$0xff] (!%p263_p2)  ;;  %v322_v22 = vld [vmem:[%s7218_s1 + $0x68] sm:$0xff] (!%p263_p2)  ;;  %v323_v24 = vld [vmem:[%s7218_s1 + $0x70] sm:$0xff] (!%p263_p2)  ;;  %v412_v43 = vadd.s32 (!%p263_p2), 1, %v6258_v41  ;;  %v6274_v60 = vsub.s32 (!%p263_p2), 0, %v6260_v42 }
   0xa   : > { %v5810_v23 = vpack.c.bf16 (!%p263_p2), %v322_v22, %v321_v21  ;;  %v324_v25 = vld [vmem:[%s7218_s1 + $0x78] sm:$0xff] (!%p263_p2)  ;;  %v325_v27 = vld [vmem:[%s7218_s1 + $0x80] sm:$0xff] (!%p263_p2)  ;;  %v326_v28 = vld [vmem:[%s7218_s1 + $0x88] sm:$0xff] (!%p263_p2)  ;;  %v6282_v62 = vsub.s32 (!%p263_p2), 1, %v6260_v42  ;;  %vm1518_vm6 = vcmask (!%p263_p2), 64512   ;;  %vm519_vm7 = vcmp.lt.s32.totalorder (!%p263_p2), %v6258_v41, 5 }
   0xb   : > { %v5813_v26 = vpack.c.bf16 (!%p263_p2), %v324_v25, %v323_v24  ;;  %v5816_v29 = vpack.c.bf16 (!%p263_p2), %v326_v28, %v325_v27  ;;  %v327_v30 = vld [vmem:[%s7218_s1 + $0x90] sm:$0xff] (!%p263_p2)  ;;  %v328_v31 = vld [vmem:[%s7218_s1 + $0x98] sm:$0xff] (!%p263_p2)  ;;  %v329_v33 = vld [vmem:[%s7218_s1 + $0xa0] sm:$0xff] (!%p263_p2)  ;;  %vm413_vm2 = vcmp.eq.s32.totalorder (!%p263_p2), %v6260_v42, %v412_v43  ;;  %v535_v27 = vsub.s32 (!%p263_p2), 4, %v6260_v42 }
   0xc   : > { %5796 = vmatpush1.bf16.msra.mxu0 (!%p263_p2), %v5795_v6  ;;  %v5819_v32 = vpack.c.bf16 (!%p263_p2), %v328_v31, %v327_v30  ;;  %v330_v34 = vld [vmem:[%s7218_s1 + $0xa8] sm:$0xff] (!%p263_p2)  ;;  %v331_v36 = vld [vmem:[%s7218_s1 + $0xb0] sm:$0xff] (!%p263_p2)  ;;  %v332_v37 = vld [vmem:[%s7218_s1 + $0xb8] sm:$0xff] (!%p263_p2)  ;;  %v4922_v44 = vsel (!%p263_p2), %vm413_vm2, 1.0, %v6105_v39  ;;  %v540_v28 = vsub.s32 (!%p263_p2), 5, %v6260_v42 }
   0xd   : > { %s7227_s28 = smov (!%p295_p3, %s4913_s28), 1  ;;  %5797 = vmatprep.subr.bf16.mxu0 %v6104_v3  ;;  %v5822_v35 = vpack.c.bf16 %v330_v34, %v329_v33  ;;  %v5825_v38 = vpack.c.bf16 %v332_v37, %v331_v36  ;;  %v304_v47 = vld [vmem:[%s7219_s2] sm:$0xff]  ;;  %v6279_v61 = vld [vmem:[%s7219_s2 + $0x8] sm:$0xff]  ;;  %v545_v18 = vld [vmem:[%s7220_s3 + $0x10] sm:$0xff] }
   0xe   : > { %s5095_s19 = sshll.u32 %s7227_s28, 3  ;;  %v512_v63 = vrot.slane %v6279_v61, %v6274_v60  ;;  %v517_v2 = vrot.slane %v6279_v61, %v6282_v62  ;;  %v548_v16 = vld [vmem:[%s7220_s3 + $0x28] sm:$0xff]  ;;  %v546_v19 = vld [vmem:[%s7220_s3 + $0x18] sm:$0xff]  ;;  %v551_v31 = vld [vmem:[%s7220_s3 + $0x40] sm:$0xff] }
   0xf   : > { %s299_s22 = scalar_lea.vmem %s7217_s0, %s5095_s19  ;;  %v5831_v21 = vpack.c.bf16 %v546_v19, %v545_v18  ;;  %v550_v22 = vld [vmem:[%s7220_s3 + $0x38] sm:$0xff]  ;;  %v552_v34 = vld [vmem:[%s7220_s3 + $0x48] sm:$0xff]  ;;  %v553_v43 = vld [vmem:[%s7220_s3 + $0x50] sm:$0xff]  ;;  %s303_s29 = scalar_lea.vmem %s7225_s8, %s5095_s19 }
  0x10   : > { %v308_v12 = vld [vmem:[%s299_s22] sm:$0xff]  ;;  %5799 = vmatpush1.bf16.msra.mxu0 %v5798_v9  ;;  %v568_v36 = vld [vmem:[%s7220_s3 + $0xc8] sm:$0xff]  ;;  %v565_v18 = vld [vmem:[%s7220_s3 + $0xb0] sm:$0xff] }
  0x11   : > { %v334_v13 = vcombine.high %v308_v12, %v308_v12  ;;  %5800 = vmatprep.subr.bf16.mxu0 %v6104_v3  ;;  %v566_v19 = vld [vmem:[%s7220_s3 + $0xb8] sm:$0xff] }
  0x13   : > { %4921 = vmatprep.mubr.msk.f32.mxu0 %vm335_vm0, %v334_v13  ;;  %v544_v13 = vld [vmem:[%s7220_s3 + $0x8] sm:$0xff] }
  0x14   : > { %5802 = vmatpush1.bf16.msra.mxu0 %v5801_v14  ;;  %v547_v14 = vld [vmem:[%s7220_s3 + $0x20] sm:$0xff] }
  0x15   : > { %5803 = vmatprep.subr.bf16.mxu0 %v6104_v3 }
  0x18   : > { %5805 = vmatpush1.bf16.msra.mxu0 %v5804_v17  ;;  %v5834_v17 = vpack.c.bf16 %v548_v16, %v547_v14  ;;  %v564_v16 = vld [vmem:[%s7220_s3 + $0xa8] sm:$0xff] }
  0x19   : > { %5806 = vmatprep.subr.bf16.mxu0 %v6104_v3 }
  0x1c   : > { %5808 = vmatpush1.bf16.msra.mxu0 %v5807_v20  ;;  %v549_v20 = vld [vmem:[%s7220_s3 + $0x30] sm:$0xff] }
  0x1d   : > { %5809 = vmatprep.subr.bf16.mxu0 %v6104_v3 }
  0x20   : > { %5811 = vmatpush1.bf16.msra.mxu0 %v5810_v23  ;;  %v5837_v23 = vpack.c.bf16 %v550_v22, %v549_v20  ;;  %v5861_v20 = vpack.c.bf16 %v566_v19, %v565_v18  ;;  %v572_v22 = vld [vmem:[%s7220_s3 + $0xe8] sm:$0xff]  ;;  %v4928_v18 = vld [vmem:[%s7221_s4 + $0x3] ss:$0 sm:$0xff] }
  0x21   : > { %5812 = vmatprep.subr.bf16.mxu0 %v6104_v3 }
  0x24   : > { %5814 = vmatpush1.bf16.msra.mxu0 %v5813_v26 }
  0x25   : > { %5815 = vmatprep.subr.bf16.mxu0 %v6104_v3 }
  0x28   : > { %5817 = vmatpush1.bf16.msra.mxu0 %v5816_v29  ;;  %v536_v29 = vrot.slane %v6279_v61, %v535_v27 }
  0x29   : > { %5818 = vmatprep.subr.bf16.mxu0 %v6104_v3 }
  0x2c   : > { %5820 = vmatpush1.bf16.msra.mxu0 %v5819_v32  ;;  %v541_v32 = vrot.slane %v6279_v61, %v540_v28 }
  0x2d   : > { %5821 = vmatprep.subr.bf16.mxu0 %v6104_v3 }
  0x30   : > { %5823 = vmatpush1.bf16.msra.mxu0 %v5822_v35  ;;  %v567_v35 = vld [vmem:[%s7220_s3 + $0xc0] sm:$0xff] }
  0x31   : > { %5824 = vmatprep.subr.bf16.mxu0 %v6104_v3  ;;  %v5864_v40 = vpack.c.bf16 %v568_v36, %v567_v35  ;;  %v587_v35 = vld [vmem:[%s7220_s3 + $0x160] sm:$0xff]  ;;  %v588_v36 = vld [vmem:[%s7220_s3 + $0x168] sm:$0xff] }
  0x34   : > { %5826 = vmatpush1.bf16.msra.mxu0 %v5825_v38  ;;  %v5840_v38 = vpack.c.bf16 %v552_v34, %v551_v31 }
  0x35   : > { %5827 = vmatprep.subr.bf16.mxu0 %v6104_v3 }
  0x37   : > { %403 = vmatmul.mubr.f32.vlgmr.msra.gmra.mrb[0].mxu0 %v308_v12  ;;  %v543_v12 = vld [vmem:[%s7220_s3] sm:$0xff] }
  0x38   : > { %5323 = vmatprep.mubr.msk.f32.mxu0 %vm6106_vm1, %v6105_v39  ;;  %v5828_v15 = vpack.c.bf16 %v544_v13, %v543_v12  ;;  %v586_v12 = vld [vmem:[%s7220_s3 + $0x158] sm:$0xff] }
  0x3a   : > { %5829 = vmatpush3.bf16.msra.mxu0 %v5828_v15  ;;  %v563_v15 = vld [vmem:[%s7220_s3 + $0xa0] sm:$0xff] }
  0x3b   : > { %5830 = vmatprep.subr.bf16.mxu0 %v6104_v3 }
  0x3e   : > { %5832 = vmatpush3.bf16.msra.mxu0 %v5831_v21  ;;  %v571_v21 = vld [vmem:[%s7220_s3 + $0xe0] sm:$0xff] }
  0x3f   : > { %5863 = vmatprep.subr.bf16.mxu0 %v6104_v3 }
 0x10a   : > { %v404_v45 = vpop.f32.mrb[0].mxu0 }
 0x10b   : > { %v406_v46 = vpop.f32.mrb[1].mxu0  ;;  %5311 = vmatpush3.msk.msra.mxu1 %vm420_vm3, %v404_v45  ;;  %v554_v45 = vld [vmem:[%s7220_s3 + $0x58] sm:$0xff] }
 0x10c   : > { %5313 = vmatmul.mubr.msk.f32.vlgmr.msra.gmra.mrb[0].mxu1 %vm416_vm4, %v4922_v44  ;;  %5833 = vmatprep.subr.bf16.mxu1 %v6104_v3  ;;  %v569_v46 = vld [vmem:[%s7220_s3 + $0xd0] sm:$0xff] }
 0x10d   : > { %5334 = vmatprep.mubr.msk.f32.mxu1 %vm6106_vm1, %v6105_v39  ;;  %5835 = vmatpush3.bf16.msra.mxu1 %v5834_v17  ;;  %v5858_v17 = vpack.c.bf16 %v564_v16, %v563_v15  ;;  %v4932_v15 = vld [vmem:[%s7221_s4 + $0x7] ss:$0 sm:$0xff] }
 0x10e   : > { %5836 = vmatprep.subr.bf16.mxu1 %v6104_v3 }
 0x111   : > { %5838 = vmatpush3.bf16.msra.mxu1 %v5837_v23  ;;  %v5870_v23 = vpack.c.bf16 %v572_v22, %v571_v21 }
 0x112   : > { %5839 = vmatprep.subr.bf16.mxu1 %v6104_v3 }
 0x1df   : > { %v490_v48 = vpop.f32.mrb[0].mxu1 }
 0x1e0   : > { %v491_v49 = vadd.f32 %v490_v48, %v304_v47  ;;  %v5314_v50 = vpop.f32.mrb[1].mxu1  ;;  %v570_v47 = vld [vmem:[%s7220_s3 + $0xd8] sm:$0xff]  ;;  %v5843_v48 = vpack.c.bf16 %v554_v45, %v553_v43 }
 0x1e1   : > { %v555_v50 = vld [vmem:[%s7220_s3 + $0x60] sm:$0xff] }
 0x1e2   : > { %v495_v51 = vsel %vm494_vm5, %v491_v49, 0.0 }
 0x1e3   : > { %496 = vadd.xlane.f32.xlu0 %v495_v51  ;;  %v556_v51 = vld [vmem:[%s7220_s3 + $0x68] sm:$0xff] }
 0x270   : > { %v497_v52 = vpop.xlane.xlu0 %496 }
 0x271   : > { %v499_v53 = vmul.f32 0.03125, %v497_v52  ;;  %v575_v52 = vld [vmem:[%s7220_s3 + $0x100] sm:$0xff] }
 0x273   : > { %v500_v54 = vsub.f32 %v491_v49, %v499_v53  ;;  %v5867_v49 = vpack.c.bf16 %v570_v47, %v569_v46  ;;  %v576_v53 = vld [vmem:[%s7220_s3 + $0x108] sm:$0xff] }
 0x275   : > { %v501_v55 = vmul.f32 %v500_v54, %v500_v54 }
 0x277   : > { %v502_v56 = vsel %vm494_vm5, %v501_v55, 0.0  ;;  %v5876_v55 = vpack.c.bf16 %v576_v53, %v575_v52 }
 0x278   : > { %503 = vadd.xlane.f32.xlu0 %v502_v56  ;;  %v557_v56 = vld [vmem:[%s7220_s3 + $0x70] sm:$0xff] }
 0x305   : > { %v504_v57 = vpop.xlane.xlu0 %503 }
 0x306   : > { %v505_v58 = vmul.f32 0.03125, %v504_v57  ;;  %v558_v57 = vld [vmem:[%s7220_s3 + $0x78] sm:$0xff] }
 0x308   : > { %v506_v59 = vadd.f32 1e-05, %v505_v58  ;;  %v577_v58 = vld [vmem:[%s7220_s3 + $0x110] sm:$0xff] }
 0x30a   : > { %6043 = vrsqrt.f32 %v506_v59  ;;  %v578_v59 = vld [vmem:[%s7220_s3 + $0x118] sm:$0xff] }
 0x314   : > { %v6044_v0 = vpop.eup %6043 }
 0x315   : > { %v508_v1 = vmul.f32 %v6044_v0, %v500_v54  ;;  %v5846_v54 = vpack.c.bf16 %v556_v51, %v555_v50  ;;  %v5879_v0 = vpack.c.bf16 %v578_v59, %v577_v58  ;;  %v4925_v59 = vld [vmem:[%s7221_s4] ss:$0 sm:$0xff] }
 0x317   : > { %v513_v4 = vmul.f32 %v512_v63, %v508_v1  ;;  %v5849_v63 = vpack.c.bf16 %v558_v57, %v557_v56  ;;  %v559_v1 = vld [vmem:[%s7220_s3 + $0x80] sm:$0xff] }
 0x318   : > { %v4929_v57 = vld [vmem:[%s7221_s4 + $0x4] ss:$0 sm:$0xff] }
 0x319   : > { %v6288_v5 = vadd.f32 %v517_v2, %v513_v4  ;;  %v560_v2 = vld [vmem:[%s7220_s3 + $0x88] sm:$0xff]  ;;  %v583_v4 = vld [vmem:[%s7220_s3 + $0x140] sm:$0xff] }
 0x31b   : > { %v520_v6 = vsel %vm494_vm5, %v6288_v5, 0.0 }
 0x31c   : > { %521 = vadd.xlane.f32.xlu1 %v520_v6  ;;  %v584_v6 = vld [vmem:[%s7220_s3 + $0x148] sm:$0xff] }
 0x3a9   : > { %v522_v7 = vpop.xlane.xlu1 %521 }
 0x3aa   : > { %v523_v8 = vmul.f32 0.03125, %v522_v7  ;;  %v5852_v7 = vpack.c.bf16 %v560_v2, %v559_v1 }
 0x3ac   : > { %v524_v9 = vsub.f32 %v6288_v5, %v523_v8  ;;  %v5888_v8 = vpack.c.bf16 %v584_v6, %v583_v4  ;;  %v4930_v4 = vld [vmem:[%s7221_s4 + $0x5] ss:$0 sm:$0xff] }
 0x3ae   : > { %v525_v10 = vmul.f32 %v524_v9, %v524_v9 }
 0x3b0   : > { %v526_v11 = vsel %vm494_vm5, %v525_v10, 0.0  ;;  %v562_v10 = vld [vmem:[%s7220_s3 + $0x98] sm:$0xff] }
 0x3b1   : > { %527 = vadd.xlane.f32.xlu1 %v526_v11  ;;  %v585_v11 = vld [vmem:[%s7220_s3 + $0x150] sm:$0xff] }
 0x3b2   : > { %v5891_v14 = vpack.c.bf16 %v586_v12, %v585_v11  ;;  %v4927_v12 = vld [vmem:[%s7221_s4 + $0x2] ss:$0 sm:$0xff] }
 0x43e   : > { %v528_v24 = vpop.xlane.xlu1 %527 }
 0x43f   : > { %v529_v25 = vmul.f32 0.03125, %v528_v24  ;;  %v573_v24 = vld [vmem:[%s7220_s3 + $0xf0] sm:$0xff] }
 0x441   : > { %v530_v26 = vadd.f32 1e-05, %v529_v25  ;;  %v574_v25 = vld [vmem:[%s7220_s3 + $0xf8] sm:$0xff] }
 0x443   : > { %6045 = vrsqrt.f32 %v530_v26  ;;  %v5873_v26 = vpack.c.bf16 %v574_v25, %v573_v24 }
 0x44d   : > { %v6046_v30 = vpop.eup %6045 }
 0x44e   : > { %v532_v33 = vmul.f32 %v6046_v30, %v524_v9  ;;  %v561_v9 = vld [vmem:[%s7220_s3 + $0x90] sm:$0xff]  ;;  %v580_v30 = vld [vmem:[%s7220_s3 + $0x128] sm:$0xff] }
 0x44f   : > { %v5855_v13 = vpack.c.bf16 %v562_v10, %v561_v9  ;;  %v4931_v10 = vld [vmem:[%s7221_s4 + $0x6] ss:$0 sm:$0xff] }
 0x450   : > { %v537_v37 = vmul.f32 %v536_v29, %v532_v33  ;;  %v579_v29 = vld [vmem:[%s7220_s3 + $0x120] sm:$0xff]  ;;  %v582_v33 = vld [vmem:[%s7220_s3 + $0x138] sm:$0xff] }
 0x451   : > { %v5882_v31 = vpack.c.bf16 %v580_v30, %v579_v29 }
 0x452   : > { %v6345_v44 = vadd.f32 %v541_v32, %v537_v37  ;;  %v581_v32 = vld [vmem:[%s7220_s3 + $0x130] sm:$0xff]  ;;  %v5894_v37 = vpack.c.bf16 %v588_v36, %v587_v35 }
 0x453   : > { %v5885_v34 = vpack.c.bf16 %v582_v33, %v581_v32 }
 0x454   : > { %5324 = vmatmul.mubr.msk.f32.vlgmr.msra.gmra.mrb[2].mxu0 %vm494_vm5, %v6345_v44  ;;  %5335 = vmatmul.mubr.msk.f32.vlgmr.msra.gmra.mrb[2].mxu1 %vm494_vm5, %v6345_v44 }
 0x455   : > { %5841 = vmatpush3.bf16.msra.mxu1 %v5840_v38  ;;  %5865 = vmatpush3.bf16.msra.mxu0 %v5864_v40  ;;  %v589_v38 = vld [vmem:[%s7220_s3 + $0x170] sm:$0xff]  ;;  %v590_v40 = vld [vmem:[%s7220_s3 + $0x178] sm:$0xff] }
 0x456   : > { %5842 = vmatprep.subr.bf16.mxu1 %v6104_v3  ;;  %5866 = vmatprep.subr.bf16.mxu0 %v6104_v3  ;;  %v5897_v43 = vpack.c.bf16 %v590_v40, %v589_v38 }
 0x457   : > { %5345 = vmatprep.mubr.msk.f32.mxu1 %vm6106_vm1, %v6105_v39  ;;  %5389 = vmatprep.mubr.msk.f32.mxu0 %vm6106_vm1, %v6105_v39 }
 0x459   : > { %5844 = vmatpush3.bf16.msra.mxu1 %v5843_v48  ;;  %5868 = vmatpush3.bf16.msra.mxu0 %v5867_v49 }
 0x45a   : > { %5845 = vmatprep.subr.bf16.mxu1 %v6104_v3  ;;  %5875 = vmatprep.subr.bf16.mxu0 %v6104_v3 }
 0x45c   : > { %5346 = vmatmul.mubr.msk.f32.vlgmr.msra.gmra.mrb[4].mxu1 %vm494_vm5, %v6345_v44  ;;  %5390 = vmatmul.mubr.msk.f32.vlgmr.msra.gmra.mrb[4].mxu0 %vm494_vm5, %v6345_v44 }
 0x45d   : > { %5847 = vmatpush3.bf16.msra.mxu1 %v5846_v54  ;;  %5877 = vmatpush3.bf16.msra.mxu0 %v5876_v55 }
 0x45e   : > { %5848 = vmatprep.subr.bf16.mxu1 %v6104_v3  ;;  %5878 = vmatprep.subr.bf16.mxu0 %v6104_v3 }
 0x45f   : > { %5356 = vmatprep.mubr.msk.f32.mxu1 %vm6106_vm1, %v6105_v39  ;;  %5411 = vmatprep.mubr.msk.f32.mxu0 %vm6106_vm1, %v6105_v39 }
 0x461   : > { %5850 = vmatpush3.bf16.msra.mxu1 %v5849_v63  ;;  %5880 = vmatpush3.bf16.msra.mxu0 %v5879_v0 }
 0x462   : > { %5851 = vmatprep.subr.bf16.mxu1 %v6104_v3  ;;  %5887 = vmatprep.subr.bf16.mxu0 %v6104_v3 }
 0x464   : > { %5357 = vmatmul.mubr.msk.f32.vlgmr.msra.gmra.mrb[6].mxu1 %vm494_vm5, %v6345_v44  ;;  %5412 = vmatmul.mubr.msk.f32.vlgmr.msra.gmra.mrb[6].mxu0 %vm494_vm5, %v6345_v44 }
 0x465   : > { %5853 = vmatpush3.bf16.msra.mxu1 %v5852_v7  ;;  %5889 = vmatpush3.bf16.msra.mxu0 %v5888_v8  ;;  %v4926_v7 = vld [vmem:[%s7221_s4 + $0x1] ss:$0 sm:$0xff] }
 0x466   : > { %5854 = vmatprep.subr.bf16.mxu1 %v6104_v3  ;;  %5890 = vmatprep.subr.bf16.mxu0 %v6104_v3 }
 0x467   : > { %5367 = vmatprep.mubr.msk.f32.mxu1 %vm6106_vm1, %v6105_v39  ;;  %5433 = vmatprep.mubr.msk.f32.mxu0 %vm6106_vm1, %v6105_v39 }
 0x469   : > { %5856 = vmatpush3.bf16.msra.mxu1 %v5855_v13  ;;  %5892 = vmatpush3.bf16.msra.mxu0 %v5891_v14  ;;  %v4933_v14 = vld [vmem:[%s7221_s4 + $0x8] ss:$0 sm:$0xff] }
 0x46a   : > { %5857 = vmatprep.subr.bf16.mxu1 %v6104_v3  ;;  %5447 = vmatprep.subr.mxu0 %v6105_v39 }
 0x46c   : > { %5368 = vmatmul.mubr.msk.f32.vlgmr.msra.gmra.mrb[8].mxu1 %vm494_vm5, %v6345_v44  ;;  %5434 = vmatmul.mubr.msk.f32.vlgmr.msra.gmra.mrb[8].mxu0 %vm494_vm5, %v6345_v44 }
 0x46d   : > { %5859 = vmatpush3.bf16.msra.mxu1 %v5858_v17  ;;  %5378 = vmatprep.mubr.msk.f32.mxu1 %vm6106_vm1, %v6105_v39 }
 0x46e   : > { %5860 = vmatprep.subr.bf16.mxu1 %v6104_v3  ;;  %5449 = vmatprep.mubr.msk.f32.mxu0 %vm6106_vm1, %v6105_v39 }
 0x471   : > { %5862 = vmatpush3.bf16.msra.mxu1 %v5861_v20 }
 0x472   : > { %5869 = vmatprep.subr.bf16.mxu1 %v6104_v3 }
 0x474   : > { %5379 = vmatmul.mubr.msk.f32.vlgmr.msra.gmra.mrb[10].mxu1 %vm494_vm5, %v6345_v44 }
 0x475   : > { %5871 = vmatpush3.bf16.msra.mxu1 %v5870_v23  ;;  %5400 = vmatprep.mubr.msk.f32.mxu1 %vm6106_vm1, %v6105_v39  ;;  %v4934_v23 = vld [vmem:[%s7221_s4 + $0x9] ss:$0 sm:$0xff] }
 0x476   : > { %5872 = vmatprep.subr.bf16.mxu1 %v6104_v3 }
 0x479   : > { %5874 = vmatpush3.bf16.msra.mxu1 %v5873_v26 }
 0x47a   : > { %5881 = vmatprep.subr.bf16.mxu1 %v6104_v3 }
 0x47c   : > { %5401 = vmatmul.mubr.msk.f32.vlgmr.msra.gmra.mrb[12].mxu1 %vm494_vm5, %v6345_v44 }
 0x47d   : > { %5883 = vmatpush3.bf16.msra.mxu1 %v5882_v31  ;;  %5422 = vmatprep.mubr.msk.f32.mxu1 %vm6106_vm1, %v6105_v39 }
 0x47e   : > { %5884 = vmatprep.subr.bf16.mxu1 %v6104_v3 }
 0x481   : > { %5886 = vmatpush3.bf16.msra.mxu1 %v5885_v34 }
 0x482   : > { %5893 = vmatprep.subr.bf16.mxu1 %v6104_v3 }
 0x484   : > { %5423 = vmatmul.mubr.msk.f32.vlgmr.msra.gmra.mrb[14].mxu1 %vm494_vm5, %v6345_v44 }
 0x485   : > { %5895 = vmatpush3.bf16.msra.mxu1 %v5894_v37  ;;  %5444 = vmatprep.mubr.msk.f32.mxu1 %vm6106_vm1, %v6105_v39 }
 0x486   : > { %5896 = vmatprep.subr.bf16.mxu1 %v6104_v3 }
 0x489   : > { %5898 = vmatpush3.bf16.msra.mxu1 %v5897_v43 }
 0x48a   : > { %5462 = vmatprep.subr.mxu1 %v6105_v39 }
 0x48c   : > { %5445 = vmatmul.mubr.msk.f32.vlgmr.msra.gmra.mrb[16].mxu1 %vm494_vm5, %v6345_v44 }
 0x48d   : > { %5464 = vmatprep.mubr.msk.f32.mxu1 %vm6106_vm1, %v6105_v39 }
 0x527   : > { %v744_v45 = vpop.f32.mrb[2].mxu0  ;;  %v814_v46 = vpop.f32.mrb[2].mxu1 }
 0x528   : > { %v5325_v47 = vpop.f32.mrb[3].mxu0  ;;  %v5336_v48 = vpop.f32.mrb[3].mxu1  ;;  %v745_v2 = vadd.f32 %v4925_v59, %v744_v45  ;;  %v815_v11 = vadd.f32 %v4926_v7, %v814_v46 }
 0x52f   : > { %v884_v49 = vpop.f32.mrb[4].mxu1  ;;  %v1164_v50 = vpop.f32.mrb[4].mxu0 }
 0x530   : > { %v5347_v51 = vpop.f32.mrb[5].mxu1  ;;  %v5391_v52 = vpop.f32.mrb[5].mxu0  ;;  %v1165_v13 = vadd.f32 %v4931_v10, %v1164_v50  ;;  %v885_v16 = vadd.f32 %v4927_v12, %v884_v49 }
 0x537   : > { %v954_v53 = vpop.f32.mrb[6].mxu1  ;;  %v1304_v54 = vpop.f32.mrb[6].mxu0 }
 0x538   : > { %v5358_v55 = vpop.f32.mrb[7].mxu1  ;;  %v5413_v56 = vpop.f32.mrb[7].mxu0  ;;  %v1305_v19 = vadd.f32 %v4933_v14, %v1304_v54  ;;  %v955_v22 = vadd.f32 %v4928_v18, %v954_v53  ;;  %v4935_v14 = vld [vmem:[%s7221_s4 + $0xa] ss:$0 sm:$0xff] }
 0x53f   : > { %v1024_v44 = vpop.f32.mrb[8].mxu1  ;;  %v6523_v58 = vpop.f32.mrb[8].mxu0 }
 0x540   : > { %v1025_v63 = vadd.f32 %v4929_v57, %v1024_v44  ;;  %v5369_v0 = vpop.f32.mrb[9].mxu1  ;;  %v5435_v1 = vpop.f32.mrb[9].mxu0  ;;  %v1445_v18 = vadd.f32 %v4935_v14, %v6523_v58  ;;  %v2498_v14 = vld [vmem:[%s7223_s6 + $0x18] sm:$0xff] }
 0x542   : > { %5448 = vmatpush3.xpose.msk.msra.mxu0 %vm1518_vm6, %v1025_v63 }
 0x543   : > { %5452 = vmatprep.subr.mxu0 %v6105_v39 }
 0x545   : > { %5450 = vmatmul.mubr.msk.f32.vlgmr.msra.gmra.mrb[10].mxu0 %vm1518_vm6, %v745_v2 }
 0x546   : > { %5454 = vmatprep.mubr.msk.f32.mxu0 %vm6106_vm1, %v6105_v39 }
 0x547   : > { %v1094_v6 = vpop.f32.mrb[10].mxu1 }
 0x548   : > { %v1095_v8 = vadd.f32 %v4930_v4, %v1094_v6  ;;  %v5380_v9 = vpop.f32.mrb[11].mxu1 }
 0x54a   : > { %5453 = vmatpush3.xpose.msk.msra.mxu0 %vm1518_vm6, %v1095_v8 }
 0x54b   : > { %5457 = vmatprep.subr.mxu0 %v6105_v39 }
 0x54d   : > { %5455 = vmatmul.mubr.msk.f32.vlgmr.msra.gmra.mrb[12].mxu0 %vm1518_vm6, %v815_v11 }
 0x54e   : > { %5458 = vmatpush3.xpose.msk.msra.mxu0 %vm1518_vm6, %v1165_v13  ;;  %5459 = vmatprep.mubr.msk.f32.mxu0 %vm6106_vm1, %v6105_v39 }
 0x54f   : > { %v1234_v17 = vpop.f32.mrb[12].mxu1  ;;  %5467 = vmatprep.subr.mxu0 %v6105_v39 }
 0x550   : > { %v1235_v20 = vadd.f32 %v4932_v15, %v1234_v17  ;;  %v5402_v21 = vpop.f32.mrb[13].mxu1 }
 0x551   : > { %5460 = vmatmul.mubr.msk.f32.vlgmr.msra.gmra.mrb[14].mxu0 %vm1518_vm6, %v885_v16 }
 0x552   : > { %5463 = vmatpush3.xpose.msk.msra.mxu1 %vm1518_vm6, %v1235_v20  ;;  %5468 = vmatpush3.msra.mxu0 %v1305_v19  ;;  %v4936_v20 = vld [vmem:[%s7221_s4 + $0xb] ss:$0 sm:$0xff] }
 0x553   : > { %5472 = vmatprep.subr.mxu1 %v6105_v39  ;;  %5469 = vmatprep.mubr.msk.f32.mxu0 %vm6106_vm1, %v6105_v39 }
 0x554   : > { %5477 = vmatprep.subr.mxu0 %v6105_v39 }
 0x555   : > { %5465 = vmatmul.mubr.msk.f32.vlgmr.msra.gmra.mrb[18].mxu1 %vm1518_vm6, %v955_v22 }
 0x556   : > { %5474 = vmatprep.mubr.msk.f32.mxu1 %vm6106_vm1, %v6105_v39 }
 0x557   : > { %v1374_v24 = vpop.f32.mrb[14].mxu1 }
 0x558   : > { %v1375_v25 = vadd.f32 %v4934_v23, %v1374_v24  ;;  %v5424_v26 = vpop.f32.mrb[15].mxu1 }
 0x55a   : > { %5473 = vmatpush3.msra.mxu1 %v1375_v25 }
 0x55b   : > { %5482 = vmatprep.subr.mxu1 %v6105_v39 }
 0x55f   : > { %v6574_v29 = vpop.f32.mrb[16].mxu1 }
 0x560   : > { %v5446_v30 = vpop.f32.mrb[17].mxu1  ;;  %v1515_v23 = vadd.f32 %v4936_v20, %v6574_v29  ;;  %v2163_v29 = vld [vmem:[%s7222_s5] sm:$0xff]  ;;  %v2492_v20 = vsub.s32 7, %v6260_v42 }
 0x561   : > { %v2164_v30 = vld [vmem:[%s7222_s5 + $0x8] sm:$0xff] }
 0x618   : > { %v1591_v31 = vpop.f32.mrb[10].mxu0 }
 0x619   : > { %v1823_v32 = vsel %vm519_vm7, %v1591_v31, -1e+30  ;;  %v5451_v33 = vpop.f32.mrb[11].mxu0  ;;  %v2165_v31 = vld [vmem:[%s7222_s5 + $0x10] sm:$0xff] }
 0x61a   : > { %v1827_v34 = vsel %vm1518_vm6, %v1823_v32, -inf }
 0x61b   : > { %1828 = vmax.xlane.f32.xlu0 %v1827_v34  ;;  %v2166_v34 = vld [vmem:[%s7222_s5 + $0x18] sm:$0xff] }
 0x620   : > { %v1667_v35 = vpop.f32.mrb[12].mxu0 }
 0x621   : > { %v1824_v36 = vsel %vm519_vm7, %v1667_v35, -1e+30  ;;  %v5456_v37 = vpop.f32.mrb[13].mxu0 }
 0x622   : > { %v1830_v38 = vsel %vm1518_vm6, %v1824_v36, -inf }
 0x623   : > { %1831 = vmax.xlane.f32.xlu1 %v1830_v38 }
 0x624   : > { %v1743_v40 = vpop.f32.mrb[14].mxu0 }
 0x625   : > { %v1825_v43 = vsel %vm519_vm7, %v1743_v40, -1e+30  ;;  %v5461_v45 = vpop.f32.mrb[15].mxu0 }
 0x626   : > { %v1833_v46 = vsel %vm1518_vm6, %v1825_v43, -inf }
 0x627   : > { %1834 = vmax.xlane.f32.xlu0 %v1833_v46 }
 0x628   : > { %v1819_v47 = vpop.f32.mrb[18].mxu1 }
 0x629   : > { %v1826_v48 = vsel %vm519_vm7, %v1819_v47, -1e+30  ;;  %v5466_v49 = vpop.f32.mrb[19].mxu1 }
 0x62a   : > { %v1836_v50 = vsel %vm1518_vm6, %v1826_v48, -inf }
 0x62b   : > { %1837 = vmax.xlane.f32.xlu1 %v1836_v50 }
 0x6a8   : > { %v1829_v51 = vpop.xlane.xlu0 %1828 }
 0x6a9   : > { %v1839_v52 = vsub.f32 %v1823_v32, %v1829_v51 }
 0x6ab   : > { %v1843_v53 = vmul.f32 1.442695, %v1839_v52 }
 0x6ad   : > { %6047 = vpow2.f32 %v1843_v53 }
 0x6b0   : > { %v1832_v54 = vpop.xlane.xlu1 %1831 }
 0x6b1   : > { %v1840_v55 = vsub.f32 %v1824_v36, %v1832_v54 }
 0x6b3   : > { %v1845_v56 = vmul.f32 1.442695, %v1840_v55 }
 0x6b4   : > { %v1835_v57 = vpop.xlane.xlu0 %1834 }
 0x6b5   : > { %6049 = vpow2.f32 %v1845_v56  ;;  %v1841_v44 = vsub.f32 %v1825_v43, %v1835_v57  ;;  %v6649_v56 = vld [vmem:[%s7219_s2 + $0x10] sm:$0xff] }
 0x6b7   : > { %v6048_v59 = vpop.eup %6047  ;;  %v1847_v63 = vmul.f32 1.442695, %v1841_v44 }
 0x6b8   : > { %v1838_v0 = vpop.xlane.xlu1 %1837  ;;  %v1851_v1 = vsel %vm1518_vm6, %v6048_v59, 0.0 }
 0x6b9   : > { %6051 = vpow2.f32 %v1847_v63  ;;  %v1842_v2 = vsub.f32 %v1826_v48, %v1838_v0  ;;  %1852 = vadd.xlane.f32.xlu0 %v1851_v1  ;;  %v2470_v0 = vrot.slane %v6649_v56, %v6274_v60 }
 0x6bb   : > { %v1849_v4 = vmul.f32 1.442695, %v1842_v2 }
 0x6bd   : > { %6053 = vpow2.f32 %v1849_v4 }
 0x6bf   : > { %v6050_v6 = vpop.eup %6049 }
 0x6c0   : > { %v1854_v7 = vsel %vm1518_vm6, %v6050_v6, 0.0 }
 0x6c1   : > { %1855 = vadd.xlane.f32.xlu1 %v1854_v7 }
 0x6c3   : > { %v6052_v8 = vpop.eup %6051 }
 0x6c4   : > { %v1857_v9 = vsel %vm1518_vm6, %v6052_v8, 0.0 }
 0x6c5   : > { %1858 = vadd.xlane.f32.xlu0 %v1857_v9 }
 0x6c7   : > { %v6054_v10 = vpop.eup %6053 }
 0x6c8   : > { %v1860_v11 = vsel %vm1518_vm6, %v6054_v10, 0.0 }
 0x6c9   : > { %1861 = vadd.xlane.f32.xlu1 %v1860_v11  ;;  %v2495_v11 = vld [vmem:[%s7223_s6] sm:$0xff] }
 0x746   : > { %v1853_v12 = vpop.xlane.xlu0 %1852 }
 0x747   : > { %6055 = vrcp.f32 %v1853_v12 }
 0x74e   : > { %v1856_v13 = vpop.xlane.xlu1 %1855 }
 0x74f   : > { %6057 = vrcp.f32 %v1856_v13  ;;  %v2497_v13 = vld [vmem:[%s7223_s6 + $0x10] sm:$0xff] }
 0x751   : > { %v6056_v15 = vpop.eup %6055 }
 0x752   : > { %v1867_v16 = vmul.f32 %v6056_v15, %v6048_v59  ;;  %v1859_v17 = vpop.xlane.xlu0 %1858  ;;  %v5903_v15 = vpack.c.bf16 %v2498_v14, %v2497_v13 }
 0x753   : > { %6059 = vrcp.f32 %v1859_v17 }
 0x754   : > { %5470 = vmatmul.mubr.msk.f32.vlgmr.msra.gmra.mrb[16].mxu0 %vm1518_vm6, %v1867_v16 }
 0x755   : > { %5478 = vmatpush3.msra.mxu0 %v1445_v18  ;;  %5479 = vmatprep.mubr.msk.f32.mxu0 %vm6106_vm1, %v6105_v39 }
 0x756   : > { %v1862_v19 = vpop.xlane.xlu1 %1861  ;;  %5487 = vmatprep.subr.mxu0 %v6105_v39 }
 0x757   : > { %6061 = vrcp.f32 %v1862_v19  ;;  %v2487_v19 = vsub.s32 6, %v6260_v42 }
 0x759   : > { %v6058_v21 = vpop.eup %6057 }
 0x75a   : > { %v1868_v22 = vmul.f32 %v6058_v21, %v6050_v6  ;;  %v2488_v21 = vrot.slane %v6279_v61, %v2487_v19 }
 0x75c   : > { %5475 = vmatmul.mubr.msk.f32.vlgmr.msra.gmra.mrb[20].mxu1 %vm1518_vm6, %v1868_v22 }
 0x75d   : > { %v6060_v58 = vpop.eup %6059  ;;  %5483 = vmatpush3.msra.mxu1 %v1515_v23  ;;  %5484 = vmatprep.mubr.msk.f32.mxu1 %vm6106_vm1, %v6105_v39 }
 0x75e   : > { %v1869_v24 = vmul.f32 %v6060_v58, %v6052_v8  ;;  %5492 = vmatprep.subr.mxu1 %v6105_v39  ;;  %v2493_v58 = vrot.slane %v6279_v61, %v2492_v20  ;;  %v2586_v61 = vld [vmem:[%s7224_s7 + $0x10] sm:$0xff] }
 0x760   : > { %5480 = vmatmul.mubr.msk.f32.vlgmr.msra.gmra.mrb[18].mxu0 %vm1518_vm6, %v1869_v24 }
 0x761   : > { %v6062_v25 = vpop.eup %6061  ;;  %5489 = vmatprep.mubr.msk.f32.mxu0 %vm6106_vm1, %v6105_v39  ;;  %5488 = vmatpush3.msra.mxu0 %v2163_v29  ;;  %v2585_v29 = vld [vmem:[%s7224_s7 + $0x8] sm:$0xff] }
 0x762   : > { %v1870_v26 = vmul.f32 %v6062_v25, %v6054_v10  ;;  %5497 = vmatprep.subr.mxu0 %v6105_v39 }
 0x764   : > { %5485 = vmatmul.mubr.msk.f32.vlgmr.msra.gmra.mrb[22].mxu1 %vm1518_vm6, %v1870_v26  ;;  %v2584_v26 = vld [vmem:[%s7224_s7] sm:$0xff] }
 0x765   : > { %5494 = vmatprep.mubr.msk.f32.mxu1 %vm6106_vm1, %v6105_v39  ;;  %5493 = vmatpush3.msra.mxu1 %v2164_v30  ;;  %v5906_v30 = vpack.c.bf16 %v2585_v29, %v2584_v26  ;;  %v4970_v26 = vld [vmem:[%s7220_s3 + $0x198] sm:$0xff]  ;;  %v4985_v29 = vld [vmem:[%s7220_s3 + $0x210] sm:$0xff] }
 0x766   : > { %5502 = vmatprep.subr.mxu1 %v6105_v39 }
 0x827   : > { %v1940_v32 = vpop.f32.mrb[16].mxu0 }
 0x828   : > { %v5471_v33 = vpop.f32.mrb[17].mxu0  ;;  %5490 = vmatmul.mubr.msk.f32.vlgmr.msra.gmra.mrb[20].mxu0 %vm1518_vm6, %v1940_v32 }
 0x829   : > { %5498 = vmatpush3.msra.mxu0 %v2165_v31  ;;  %5499 = vmatprep.mubr.msk.f32.mxu0 %vm6106_vm1, %v6105_v39  ;;  %v2587_v31 = vld [vmem:[%s7224_s7 + $0x18] sm:$0xff]  ;;  %v2588_v33 = vld [vmem:[%s7224_s7 + $0x20] sm:$0xff] }
 0x82a   : > { %5899 = vmatprep.subr.bf16.mxu0 %v6104_v3  ;;  %v5909_v32 = vpack.c.bf16 %v2587_v31, %v2586_v61  ;;  %v4986_v61 = vld [vmem:[%s7220_s3 + $0x218] sm:$0xff] }
 0x82b   : > { %v5957_v31 = vpack.c.bf16 %v4986_v61, %v4985_v29  ;;  %v4990_v61 = vld [vmem:[%s7220_s3 + $0x238] sm:$0xff] }
 0x82f   : > { %v2013_v35 = vpop.f32.mrb[20].mxu1 }
 0x830   : > { %v5476_v36 = vpop.f32.mrb[21].mxu1  ;;  %5495 = vmatmul.mubr.msk.f32.vlgmr.msra.gmra.mrb[24].mxu1 %vm1518_vm6, %v2013_v35 }
 0x831   : > { %5503 = vmatpush3.msra.mxu1 %v2166_v34  ;;  %5504 = vmatprep.mubr.msk.f32.mxu1 %vm6106_vm1, %v6105_v39  ;;  %v2589_v34 = vld [vmem:[%s7224_s7 + $0x28] sm:$0xff]  ;;  %v2590_v36 = vld [vmem:[%s7224_s7 + $0x30] sm:$0xff] }
 0x832   : > { %5905 = vmatprep.subr.bf16.mxu1 %v6104_v3  ;;  %v5912_v35 = vpack.c.bf16 %v2589_v34, %v2588_v33 }
 0x833   : > { %v2086_v37 = vpop.f32.mrb[18].mxu0 }
 0x834   : > { %v5481_v38 = vpop.f32.mrb[19].mxu0  ;;  %5500 = vmatmul.mubr.msk.f32.vlgmr.msra.gmra.mrb[22].mxu0 %vm1518_vm6, %v2086_v37  ;;  %v2591_v37 = vld [vmem:[%s7224_s7 + $0x38] sm:$0xff] }
 0x835   : > { %5515 = vmatprep.mubr.msk.f32.mxu0 %vm6106_vm1, %v6105_v39  ;;  %v5915_v38 = vpack.c.bf16 %v2591_v37, %v2590_v36 }
 0x837   : > { %v2159_v40 = vpop.f32.mrb[22].mxu1 }
 0x838   : > { %v5486_v43 = vpop.f32.mrb[23].mxu1  ;;  %5505 = vmatmul.mubr.msk.f32.vlgmr.msra.gmra.mrb[26].mxu1 %vm1518_vm6, %v2159_v40  ;;  %v2592_v40 = vld [vmem:[%s7224_s7 + $0x40] sm:$0xff] }
 0x839   : > { %5550 = vmatprep.mubr.msk.f32.mxu1 %vm6106_vm1, %v6105_v39  ;;  %5907 = vmatpush3.bf16.msra.mxu1 %v5906_v30  ;;  %v2593_v43 = vld [vmem:[%s7224_s7 + $0x48] sm:$0xff] }
 0x83a   : > { %5908 = vmatprep.subr.bf16.mxu1 %v6104_v3 }
 0x83d   : > { %5910 = vmatpush3.bf16.msra.mxu1 %v5909_v32 }
 0x83e   : > { %5911 = vmatprep.subr.bf16.mxu1 %v6104_v3 }
 0x841   : > { %5913 = vmatpush3.bf16.msra.mxu1 %v5912_v35  ;;  %v2691_v35 = vsub.s32 3, %v6260_v42 }
 0x842   : > { %5914 = vmatprep.subr.bf16.mxu1 %v6104_v3 }
 0x843   : > { %v2692_v36 = vrot.slane %v6649_v56, %v2691_v35 }
 0x845   : > { %5916 = vmatpush3.bf16.msra.mxu1 %v5915_v38  ;;  %v4971_v38 = vld [vmem:[%s7220_s3 + $0x1a0] sm:$0xff] }
 0x846   : > { %5917 = vmatprep.subr.bf16.mxu1 %v6104_v3 }
 0x8fb   : > { %v2236_v45 = vpop.f32.mrb[20].mxu0 }
 0x8fc   : > { %v5491_v46 = vpop.f32.mrb[21].mxu0  ;;  %v2459_v48 = vsel %vm494_vm5, %v2236_v45, 0.0  ;;  %v5918_v45 = vpack.c.bf16 %v2593_v43, %v2592_v40  ;;  %v2697_v40 = vrot.slane %v6649_v56, %v535_v27  ;;  %v4973_v27 = vld [vmem:[%s7220_s3 + $0x1b0] sm:$0xff] }
 0x8fd   : > { %v2594_v46 = vld [vmem:[%s7224_s7 + $0x50] sm:$0xff] }
 0x8fe   : > { %5919 = vmatpush3.bf16.msra.mxu1 %v5918_v45  ;;  %v4972_v45 = vld [vmem:[%s7220_s3 + $0x1a8] sm:$0xff] }
 0x8ff   : > { %5920 = vmatprep.subr.bf16.mxu1 %v6104_v3 }
 0x903   : > { %v2309_v47 = vpop.f32.mrb[24].mxu1 }
 0x904   : > { %v2460_v49 = vsel %vm494_vm5, %v2309_v47, 0.0  ;;  %v5496_v50 = vpop.f32.mrb[25].mxu1  ;;  %v2595_v47 = vld [vmem:[%s7224_s7 + $0x58] sm:$0xff] }
 0x905   : > { %v2461_v51 = vadd.f32 %v2460_v49, %v2459_v48  ;;  %v5921_v48 = vpack.c.bf16 %v2595_v47, %v2594_v46  ;;  %v2596_v49 = vld [vmem:[%s7224_s7 + $0x60] sm:$0xff]  ;;  %v2597_v50 = vld [vmem:[%s7224_s7 + $0x68] sm:$0xff] }
 0x906   : > { %v4991_v46 = vld [vmem:[%s7220_s3 + $0x240] sm:$0xff]  ;;  %v4992_v47 = vld [vmem:[%s7220_s3 + $0x248] sm:$0xff] }
 0x907   : > { %v2382_v52 = vpop.f32.mrb[22].mxu0  ;;  %5922 = vmatpush3.bf16.msra.mxu1 %v5921_v48 }
 0x908   : > { %v2462_v53 = vsel %vm494_vm5, %v2382_v52, 0.0  ;;  %v5501_v54 = vpop.f32.mrb[23].mxu0  ;;  %5923 = vmatprep.subr.bf16.mxu1 %v6104_v3  ;;  %v2598_v52 = vld [vmem:[%s7224_s7 + $0x70] sm:$0xff] }
 0x909   : > { %v2463_v55 = vadd.f32 %v2462_v53, %v2461_v51  ;;  %v5924_v51 = vpack.c.bf16 %v2597_v50, %v2596_v49  ;;  %v2599_v53 = vld [vmem:[%s7224_s7 + $0x78] sm:$0xff]  ;;  %v5936_v49 = vpack.c.bf16 %v4972_v45, %v4971_v38  ;;  %v5966_v50 = vpack.c.bf16 %v4992_v47, %v4991_v46  ;;  %v5005_v46 = vld [vmem:[%s7220_s3 + $0x2b0] sm:$0xff] }
 0x90a   : > { %v5927_v54 = vpack.c.bf16 %v2599_v53, %v2598_v52  ;;  %v4974_v52 = vld [vmem:[%s7220_s3 + $0x1b8] sm:$0xff]  ;;  %v4993_v53 = vld [vmem:[%s7220_s3 + $0x250] sm:$0xff] }
 0x90b   : > { %v2455_v57 = vpop.f32.mrb[26].mxu1  ;;  %5925 = vmatpush3.bf16.msra.mxu1 %v5924_v51  ;;  %v5006_v47 = vld [vmem:[%s7220_s3 + $0x2b8] sm:$0xff] }
 0x90c   : > { %v2464_v44 = vsel %vm494_vm5, %v2455_v57, 0.0  ;;  %v5506_v59 = vpop.f32.mrb[27].mxu1  ;;  %5926 = vmatprep.subr.bf16.mxu1 %v6104_v3 }
 0x90d   : > { %v2465_v63 = vadd.f32 %v2464_v44, %v2463_v55  ;;  %v2501_v55 = vsub.s32 2, %v6260_v42 }
 0x90f   : > { %v2466_v1 = vadd.f32 %v2465_v63, %v6288_v5  ;;  %v2496_v5 = vld [vmem:[%s7223_s6 + $0x8] sm:$0xff]  ;;  %5928 = vmatpush3.bf16.msra.mxu1 %v5927_v54  ;;  %v2502_v57 = vrot.slane %v6649_v56, %v2501_v55  ;;  %v4994_v54 = vld [vmem:[%s7220_s3 + $0x258] sm:$0xff] }
 0x910   : > { %v5900_v12 = vpack.c.bf16 %v2496_v5, %v2495_v11  ;;  %5953 = vmatprep.subr.bf16.mxu1 %v6104_v3 }
 0x911   : > { %v6655_v2 = vadd.f32 %v2470_v0, %v2466_v1 }
 0x912   : > { %5901 = vmatpush3.bf16.msra.mxu0 %v5900_v12 }
 0x913   : > { %v2472_v4 = vsel %vm494_vm5, %v6655_v2, 0.0  ;;  %5902 = vmatprep.subr.bf16.mxu0 %v6104_v3 }
 0x914   : > { %2473 = vadd.xlane.f32.xlu0 %v2472_v4 }
 0x916   : > { %5904 = vmatpush3.bf16.msra.mxu0 %v5903_v15 }
 0x917   : > { %5929 = vmatprep.subr.bf16.mxu0 %v6104_v3 }
 0x9a1   : > { %v2474_v6 = vpop.xlane.xlu0 %2473 }
 0x9a2   : > { %v2475_v7 = vmul.f32 0.03125, %v2474_v6 }
 0x9a4   : > { %v2476_v8 = vsub.f32 %v6655_v2, %v2475_v7 }
 0x9a6   : > { %v2477_v9 = vmul.f32 %v2476_v8, %v2476_v8 }
 0x9a8   : > { %v2478_v10 = vsel %vm494_vm5, %v2477_v9, 0.0  ;;  %v2674_v9 = vrot.slane %v6649_v56, %v6282_v62 }
 0x9a9   : > { %2479 = vadd.xlane.f32.xlu1 %v2478_v10 }
 0xa36   : > { %v2480_v16 = vpop.xlane.xlu1 %2479 }
 0xa37   : > { %v2481_v17 = vmul.f32 0.03125, %v2480_v16 }
 0xa39   : > { %v2482_v18 = vadd.f32 1e-05, %v2481_v17 }
 0xa3b   : > { %6063 = vrsqrt.f32 %v2482_v18 }
 0xa45   : > { %v6064_v22 = vpop.eup %6063 }
 0xa46   : > { %v2484_v23 = vmul.f32 %v6064_v22, %v2476_v8  ;;  %v4983_v22 = vld [vmem:[%s7220_s3 + $0x200] sm:$0xff] }
 0xa48   : > { %v2489_v24 = vmul.f32 %v2488_v21, %v2484_v23  ;;  %v4967_v21 = vld [vmem:[%s7220_s3 + $0x180] sm:$0xff] }
 0xa4a   : > { %v2494_v25 = vadd.f32 %v2493_v58, %v2489_v24  ;;  %v4984_v58 = vld [vmem:[%s7220_s3 + $0x208] sm:$0xff] }
 0xa4b   : > { %v5954_v24 = vpack.c.bf16 %v4984_v58, %v4983_v22  ;;  %v5009_v22 = vld [vmem:[%s7220_s3 + $0x2d0] sm:$0xff] }
 0xa4c   : > { %5516 = vmatmul.mubr.msk.f32.vlgmr.msra.gmra.mrb[24].mxu0 %vm494_vm5, %v2494_v25  ;;  %v4969_v25 = vld [vmem:[%s7220_s3 + $0x190] sm:$0xff] }
 0xa4d   : > { %5561 = vmatprep.mubr.msk.f32.mxu0 %vm6106_vm1, %v6105_v39  ;;  %v5933_v30 = vpack.c.bf16 %v4970_v26, %v4969_v25  ;;  %v4987_v25 = vld [vmem:[%s7220_s3 + $0x220] sm:$0xff]  ;;  %v4988_v26 = vld [vmem:[%s7220_s3 + $0x228] sm:$0xff] }
 0xa4e   : > { %v5960_v29 = vpack.c.bf16 %v4988_v26, %v4987_v25  ;;  %v5028_v26 = vld [vmem:[%s7221_s4 + $0xd] ss:$0 sm:$0xff] }
 0xb1f   : > { %v2572_v44 = vpop.f32.mrb[24].mxu0 }
 0xb20   : > { %v2573_v59 = vadd.f32 %v2572_v44, %v2502_v57  ;;  %v5517_v63 = vpop.f32.mrb[25].mxu0  ;;  %v5939_v57 = vpack.c.bf16 %v4974_v52, %v4973_v27  ;;  %v5969_v44 = vpack.c.bf16 %v4994_v54, %v4993_v53  ;;  %v5013_v52 = vld [vmem:[%s7220_s3 + $0x2f0] sm:$0xff]  ;;  %v5014_v53 = vld [vmem:[%s7220_s3 + $0x2f8] sm:$0xff] }
 0xb21   : > { %v4976_v63 = vld [vmem:[%s7220_s3 + $0x1c8] sm:$0xff]  ;;  %v5999_v54 = vpack.c.bf16 %v5014_v53, %v5013_v52 }
 0xb22   : > { %v4966_v0 = vmul.f32 -1.702, %v2573_v59 }
 0xb24   : > { %v2578_v1 = vmul.f32 1.442695, %v4966_v0  ;;  %v4999_v0 = vld [vmem:[%s7220_s3 + $0x280] sm:$0xff] }
 0xb26   : > { %6065 = vpow2.f32 %v2578_v1  ;;  %v5000_v1 = vld [vmem:[%s7220_s3 + $0x288] sm:$0xff] }
 0xb30   : > { %v6066_v4 = vpop.eup %6065 }
 0xb31   : > { %v2580_v6 = vadd.f32 1.0, %v6066_v4 }
 0xb33   : > { %6067 = vrcp.f32 %v2580_v6  ;;  %v5978_v6 = vpack.c.bf16 %v5000_v1, %v4999_v0 }
 0xb3d   : > { %v6068_v7 = vpop.eup %6067 }
 0xb3e   : > { %v2583_v8 = vmul.f32 %v6068_v7, %v2573_v59  ;;  %v4975_v59 = vld [vmem:[%s7220_s3 + $0x1c0] sm:$0xff]  ;;  %v4977_v7 = vld [vmem:[%s7220_s3 + $0x1d0] sm:$0xff] }
 0xb3f   : > { %v5942_v4 = vpack.c.bf16 %v4976_v63, %v4975_v59  ;;  %v5027_v63 = vld [vmem:[%s7221_s4 + $0xc] ss:$0 sm:$0xff] }
 0xb40   : > { %5551 = vmatmul.mubr.f32.vlgmr.msra.gmra.mrb[28].mxu1 %v2583_v8  ;;  %v4978_v8 = vld [vmem:[%s7220_s3 + $0x1d8] sm:$0xff] }
 0xb41   : > { %5605 = vmatprep.mubr.msk.f32.mxu1 %vm6106_vm1, %v6105_v39  ;;  %5955 = vmatpush3.bf16.msra.mxu1 %v5954_v24 }
 0xb42   : > { %5956 = vmatprep.subr.bf16.mxu1 %v6104_v3 }
 0xb45   : > { %5958 = vmatpush3.bf16.msra.mxu1 %v5957_v31 }
 0xb46   : > { %5965 = vmatprep.subr.bf16.mxu1 %v6104_v3 }
 0xc13   : > { %v2666_v10 = vpop.f32.mrb[28].mxu1 }
 0xc14   : > { %v2670_v11 = vadd.f32 %v2666_v10, %v6655_v2  ;;  %v5552_v5 = vpop.f32.mrb[29].mxu1  ;;  %v4968_v2 = vld [vmem:[%s7220_s3 + $0x188] sm:$0xff]  ;;  %v5002_v10 = vld [vmem:[%s7220_s3 + $0x298] sm:$0xff] }
 0xc15   : > { %v5930_v23 = vpack.c.bf16 %v4968_v2, %v4967_v21  ;;  %v4981_v21 = vld [vmem:[%s7220_s3 + $0x1f0] sm:$0xff]  ;;  %v4982_v2 = vld [vmem:[%s7220_s3 + $0x1f8] sm:$0xff] }
 0xc16   : > { %v6751_v12 = vadd.f32 %v2674_v9, %v2670_v11  ;;  %v5001_v9 = vld [vmem:[%s7220_s3 + $0x290] sm:$0xff]  ;;  %v5945_v11 = vpack.c.bf16 %v4978_v8, %v4977_v7  ;;  %v5951_v58 = vpack.c.bf16 %v4982_v2, %v4981_v21 }
 0xc17   : > { %5931 = vmatpush3.bf16.msra.mxu0 %v5930_v23  ;;  %v5981_v5 = vpack.c.bf16 %v5002_v10, %v5001_v9  ;;  %v5010_v23 = vld [vmem:[%s7220_s3 + $0x2d8] sm:$0xff] }
 0xc18   : > { %v2676_v13 = vsel %vm494_vm5, %v6751_v12, 0.0  ;;  %5932 = vmatprep.subr.bf16.mxu0 %v6104_v3  ;;  %v5993_v24 = vpack.c.bf16 %v5010_v23, %v5009_v22 }
 0xc19   : > { %2677 = vadd.xlane.f32.xlu0 %v2676_v13  ;;  %v4979_v13 = vld [vmem:[%s7220_s3 + $0x1e0] sm:$0xff] }
 0xc1b   : > { %5934 = vmatpush3.bf16.msra.mxu0 %v5933_v30  ;;  %v4989_v30 = vld [vmem:[%s7220_s3 + $0x230] sm:$0xff] }
 0xc1c   : > { %5935 = vmatprep.subr.bf16.mxu0 %v6104_v3  ;;  %v5963_v31 = vpack.c.bf16 %v4990_v61, %v4989_v30 }
 0xca6   : > { %v2678_v14 = vpop.xlane.xlu0 %2677 }
 0xca7   : > { %v2679_v15 = vmul.f32 0.03125, %v2678_v14  ;;  %v4980_v14 = vld [vmem:[%s7220_s3 + $0x1e8] sm:$0xff] }
 0xca9   : > { %v2680_v16 = vsub.f32 %v6751_v12, %v2679_v15  ;;  %v5007_v15 = vld [vmem:[%s7220_s3 + $0x2c0] sm:$0xff] }
 0xcab   : > { %v2681_v17 = vmul.f32 %v2680_v16, %v2680_v16 }
 0xcad   : > { %v2682_v18 = vsel %vm494_vm5, %v2681_v17, 0.0  ;;  %v5948_v17 = vpack.c.bf16 %v4980_v14, %v4979_v13  ;;  %v5035_v13 = vld [vmem:[%s7221_s4 + $0x14] ss:$0 sm:$0xff] }
 0xcae   : > { %2683 = vadd.xlane.f32.xlu1 %v2682_v18 }
 0xd3b   : > { %v2684_v32 = vpop.xlane.xlu1 %2683 }
 0xd3c   : > { %v2685_v33 = vmul.f32 0.03125, %v2684_v32  ;;  %v4995_v32 = vld [vmem:[%s7220_s3 + $0x260] sm:$0xff] }
 0xd3e   : > { %v2686_v34 = vadd.f32 1e-05, %v2685_v33  ;;  %v4996_v33 = vld [vmem:[%s7220_s3 + $0x268] sm:$0xff] }
 0xd40   : > { %6069 = vrsqrt.f32 %v2686_v34  ;;  %v5972_v34 = vpack.c.bf16 %v4996_v33, %v4995_v32  ;;  %v5030_v33 = vld [vmem:[%s7221_s4 + $0xf] ss:$0 sm:$0xff] }
 0xd4a   : > { %v6070_v37 = vpop.eup %6069 }
 0xd4b   : > { %v2688_v43 = vmul.f32 %v6070_v37, %v2680_v16  ;;  %v5008_v16 = vld [vmem:[%s7220_s3 + $0x2c8] sm:$0xff]  ;;  %v4998_v37 = vld [vmem:[%s7220_s3 + $0x278] sm:$0xff] }
 0xd4c   : > { %v5990_v18 = vpack.c.bf16 %v5008_v16, %v5007_v15 }
 0xd4d   : > { %v2693_v48 = vmul.f32 %v2692_v36, %v2688_v43  ;;  %v4997_v36 = vld [vmem:[%s7220_s3 + $0x270] sm:$0xff]  ;;  %v5004_v43 = vld [vmem:[%s7220_s3 + $0x2a8] sm:$0xff] }
 0xd4e   : > { %v5975_v38 = vpack.c.bf16 %v4998_v37, %v4997_v36 }
 0xd4f   : > { %v6807_v51 = vadd.f32 %v2697_v40, %v2693_v48  ;;  %v5003_v40 = vld [vmem:[%s7220_s3 + $0x2a0] sm:$0xff]  ;;  %v5987_v48 = vpack.c.bf16 %v5006_v47, %v5005_v46 }
 0xd50   : > { %v5984_v45 = vpack.c.bf16 %v5004_v43, %v5003_v40 }
 0xd51   : > { %5562 = vmatmul.mubr.msk.f32.vlgmr.msra.gmra.mrb[26].mxu0 %vm494_vm5, %v6807_v51  ;;  %5606 = vmatmul.mubr.msk.f32.vlgmr.msra.gmra.mrb[30].mxu1 %vm494_vm5, %v6807_v51 }
 0xd52   : > { %5937 = vmatpush3.bf16.msra.mxu0 %v5936_v49  ;;  %5967 = vmatpush3.bf16.msra.mxu1 %v5966_v50  ;;  %v5011_v49 = vld [vmem:[%s7220_s3 + $0x2e0] sm:$0xff]  ;;  %v5012_v50 = vld [vmem:[%s7220_s3 + $0x2e8] sm:$0xff] }
 0xd53   : > { %5938 = vmatprep.subr.bf16.mxu0 %v6104_v3  ;;  %5968 = vmatprep.subr.bf16.mxu1 %v6104_v3  ;;  %v5996_v27 = vpack.c.bf16 %v5012_v50, %v5011_v49 }
 0xd54   : > { %5572 = vmatprep.mubr.msk.f32.mxu0 %vm6106_vm1, %v6105_v39  ;;  %5627 = vmatprep.mubr.msk.f32.mxu1 %vm6106_vm1, %v6105_v39 }
 0xd56   : > { %5940 = vmatpush3.bf16.msra.mxu0 %v5939_v57  ;;  %5970 = vmatpush3.bf16.msra.mxu1 %v5969_v44  ;;  %v5031_v57 = vld [vmem:[%s7221_s4 + $0x10] ss:$0 sm:$0xff] }
 0xd57   : > { %5941 = vmatprep.subr.bf16.mxu0 %v6104_v3  ;;  %5977 = vmatprep.subr.bf16.mxu1 %v6104_v3 }
 0xd59   : > { %5573 = vmatmul.mubr.msk.f32.vlgmr.msra.gmra.mrb[28].mxu0 %vm494_vm5, %v6807_v51  ;;  %5628 = vmatmul.mubr.msk.f32.vlgmr.msra.gmra.mrb[32].mxu1 %vm494_vm5, %v6807_v51 }
 0xd5a   : > { %5943 = vmatpush3.bf16.msra.mxu0 %v5942_v4  ;;  %5979 = vmatpush3.bf16.msra.mxu1 %v5978_v6 }
 0xd5b   : > { %5944 = vmatprep.subr.bf16.mxu0 %v6104_v3  ;;  %5980 = vmatprep.subr.bf16.mxu1 %v6104_v3 }
 0xd5c   : > { %5583 = vmatprep.mubr.msk.f32.mxu0 %vm6106_vm1, %v6105_v39  ;;  %5649 = vmatprep.mubr.msk.f32.mxu1 %vm6106_vm1, %v6105_v39 }
 0xd5e   : > { %5946 = vmatpush3.bf16.msra.mxu0 %v5945_v11  ;;  %5982 = vmatpush3.bf16.msra.mxu1 %v5981_v5  ;;  %v5029_v5 = vld [vmem:[%s7221_s4 + $0xe] ss:$0 sm:$0xff] }
 0xd5f   : > { %5947 = vmatprep.subr.bf16.mxu0 %v6104_v3  ;;  %5989 = vmatprep.subr.bf16.mxu1 %v6104_v3 }
 0xd61   : > { %5584 = vmatmul.mubr.msk.f32.vlgmr.msra.gmra.mrb[30].mxu0 %vm494_vm5, %v6807_v51  ;;  %5650 = vmatmul.mubr.msk.f32.vlgmr.msra.gmra.mrb[34].mxu1 %vm494_vm5, %v6807_v51 }
 0xd62   : > { %5949 = vmatpush3.bf16.msra.mxu0 %v5948_v17  ;;  %5991 = vmatpush3.bf16.msra.mxu1 %v5990_v18 }
 0xd63   : > { %5950 = vmatprep.subr.bf16.mxu0 %v6104_v3  ;;  %5992 = vmatprep.subr.bf16.mxu1 %v6104_v3 }
 0xd64   : > { %5594 = vmatprep.mubr.msk.f32.mxu0 %vm6106_vm1, %v6105_v39  ;;  %5671 = vmatprep.mubr.msk.f32.mxu1 %vm6106_vm1, %v6105_v39 }
 0xd66   : > { %5952 = vmatpush3.bf16.msra.mxu0 %v5951_v58  ;;  %5994 = vmatpush3.bf16.msra.mxu1 %v5993_v24  ;;  %v5032_v24 = vld [vmem:[%s7221_s4 + $0x11] ss:$0 sm:$0xff] }
 0xd67   : > { %5959 = vmatprep.subr.bf16.mxu0 %v6104_v3  ;;  %5685 = vmatprep.subr.mxu1 %v6105_v39 }
 0xd69   : > { %5595 = vmatmul.mubr.msk.f32.vlgmr.msra.gmra.mrb[32].mxu0 %vm494_vm5, %v6807_v51  ;;  %5672 = vmatmul.mubr.msk.f32.vlgmr.msra.gmra.mrb[36].mxu1 %vm494_vm5, %v6807_v51 }
 0xd6a   : > { %5961 = vmatpush3.bf16.msra.mxu0 %v5960_v29  ;;  %5616 = vmatprep.mubr.msk.f32.mxu0 %vm6106_vm1, %v6105_v39 }
 0xd6b   : > { %5962 = vmatprep.subr.bf16.mxu0 %v6104_v3  ;;  %5687 = vmatprep.mubr.msk.f32.mxu1 %vm6106_vm1, %v6105_v39 }
 0xd6e   : > { %5964 = vmatpush3.bf16.msra.mxu0 %v5963_v31  ;;  %v5034_v31 = vld [vmem:[%s7221_s4 + $0x13] ss:$0 sm:$0xff] }
 0xd6f   : > { %5971 = vmatprep.subr.bf16.mxu0 %v6104_v3 }
 0xd71   : > { %5617 = vmatmul.mubr.msk.f32.vlgmr.msra.gmra.mrb[34].mxu0 %vm494_vm5, %v6807_v51 }
 0xd72   : > { %5973 = vmatpush3.bf16.msra.mxu0 %v5972_v34  ;;  %5638 = vmatprep.mubr.msk.f32.mxu0 %vm6106_vm1, %v6105_v39 }
 0xd73   : > { %5974 = vmatprep.subr.bf16.mxu0 %v6104_v3 }
 0xd76   : > { %5976 = vmatpush3.bf16.msra.mxu0 %v5975_v38  ;;  %v5036_v38 = vld [vmem:[%s7221_s4 + $0x15] ss:$0 sm:$0xff] }
 0xd77   : > { %5983 = vmatprep.subr.bf16.mxu0 %v6104_v3 }
 0xd79   : > { %5639 = vmatmul.mubr.msk.f32.vlgmr.msra.gmra.mrb[36].mxu0 %vm494_vm5, %v6807_v51 }
 0xd7a   : > { %5985 = vmatpush3.bf16.msra.mxu0 %v5984_v45  ;;  %5660 = vmatprep.mubr.msk.f32.mxu0 %vm6106_vm1, %v6105_v39 }
 0xd7b   : > { %5986 = vmatprep.subr.bf16.mxu0 %v6104_v3 }
 0xd7e   : > { %5988 = vmatpush3.bf16.msra.mxu0 %v5987_v48 }
 0xd7f   : > { %5995 = vmatprep.subr.bf16.mxu0 %v6104_v3 }
 0xd81   : > { %5661 = vmatmul.mubr.msk.f32.vlgmr.msra.gmra.mrb[38].mxu0 %vm494_vm5, %v6807_v51 }
 0xd82   : > { %5997 = vmatpush3.bf16.msra.mxu0 %v5996_v27  ;;  %5682 = vmatprep.mubr.msk.f32.mxu0 %vm6106_vm1, %v6105_v39 }
 0xd83   : > { %5998 = vmatprep.subr.bf16.mxu0 %v6104_v3 }
 0xd86   : > { %6000 = vmatpush3.bf16.msra.mxu0 %v5999_v54 }
 0xd87   : > { %5695 = vmatprep.subr.mxu0 %v6105_v39 }
 0xd89   : > { %5683 = vmatmul.mubr.msk.f32.vlgmr.msra.gmra.mrb[40].mxu0 %vm494_vm5, %v6807_v51  ;;  %v5033_v51 = vld [vmem:[%s7221_s4 + $0x12] ss:$0 sm:$0xff] }
 0xd8a   : > { %5697 = vmatprep.mubr.msk.f32.mxu0 %vm6106_vm1, %v6105_v39 }
 0xe24   : > { %v2902_v44 = vpop.f32.mrb[26].mxu0  ;;  %v3182_v59 = vpop.f32.mrb[30].mxu1 }
 0xe25   : > { %v3183_v0 = vadd.f32 %v5031_v57, %v3182_v59  ;;  %v5563_v1 = vpop.f32.mrb[27].mxu0  ;;  %v5607_v4 = vpop.f32.mrb[31].mxu1  ;;  %v2903_v6 = vadd.f32 %v5027_v63, %v2902_v44 }
 0xe27   : > { %5686 = vmatpush3.xpose.msk.msra.mxu1 %vm1518_vm6, %v3183_v0 }
 0xe28   : > { %5690 = vmatprep.subr.mxu1 %v6105_v39 }
 0xe2a   : > { %5688 = vmatmul.mubr.msk.f32.vlgmr.msra.gmra.mrb[38].mxu1 %vm1518_vm6, %v2903_v6 }
 0xe2b   : > { %5692 = vmatprep.mubr.msk.f32.mxu1 %vm6106_vm1, %v6105_v39 }
 0xe2c   : > { %v2972_v7 = vpop.f32.mrb[28].mxu0  ;;  %v3322_v8 = vpop.f32.mrb[32].mxu1 }
 0xe2d   : > { %v3323_v9 = vadd.f32 %v5033_v51, %v3322_v8  ;;  %v5574_v10 = vpop.f32.mrb[29].mxu0  ;;  %v5629_v11 = vpop.f32.mrb[33].mxu1  ;;  %v2973_v61 = vadd.f32 %v5028_v26, %v2972_v7 }
 0xe2f   : > { %5696 = vmatpush3.xpose.msk.msra.mxu0 %vm1518_vm6, %v3323_v9 }
 0xe30   : > { %5705 = vmatprep.subr.mxu0 %v6105_v39 }
 0xe34   : > { %v3042_v14 = vpop.f32.mrb[30].mxu0  ;;  %v3462_v15 = vpop.f32.mrb[34].mxu1 }
 0xe35   : > { %v3043_v16 = vadd.f32 %v5029_v5, %v3042_v14  ;;  %v3463_v17 = vadd.f32 %v5035_v13, %v3462_v15  ;;  %v5585_v18 = vpop.f32.mrb[31].mxu0  ;;  %v5651_v21 = vpop.f32.mrb[35].mxu1 }
 0xe37   : > { %5698 = vmatmul.mubr.msk.f32.vlgmr.msra.gmra.mrb[42].mxu0 %vm1518_vm6, %v3043_v16 }
 0xe38   : > { %5706 = vmatpush3.msra.mxu0 %v3463_v17  ;;  %5707 = vmatprep.mubr.msk.f32.mxu0 %vm6106_vm1, %v6105_v39 }
 0xe39   : > { %5715 = vmatprep.subr.mxu0 %v6105_v39 }
 0xe3c   : > { %v3112_v2 = vpop.f32.mrb[32].mxu0  ;;  %v7008_v22 = vpop.f32.mrb[36].mxu1 }
 0xe3d   : > { %v5596_v23 = vpop.f32.mrb[33].mxu0  ;;  %v5673_v58 = vpop.f32.mrb[37].mxu1  ;;  %v3113_v37 = vadd.f32 %v5030_v33, %v3112_v2 }
 0xe44   : > { %v3252_v25 = vpop.f32.mrb[34].mxu0 }
 0xe45   : > { %v3253_v29 = vadd.f32 %v5032_v24, %v3252_v25  ;;  %v5618_v30 = vpop.f32.mrb[35].mxu0 }
 0xe46   : > { %v5037_v30 = vld [vmem:[%s7221_s4 + $0x16] ss:$0 sm:$0xff] }
 0xe47   : > { %5691 = vmatpush3.xpose.msk.msra.mxu1 %vm1518_vm6, %v3253_v29 }
 0xe48   : > { %5700 = vmatprep.subr.mxu1 %v6105_v39 }
 0xe4a   : > { %5693 = vmatmul.mubr.msk.f32.vlgmr.msra.gmra.mrb[40].mxu1 %vm1518_vm6, %v2973_v61 }
 0xe4b   : > { %5702 = vmatprep.mubr.msk.f32.mxu1 %vm6106_vm1, %v6105_v39 }
 0xe4c   : > { %v3392_v32 = vpop.f32.mrb[36].mxu0 }
 0xe4d   : > { %v3393_v34 = vadd.f32 %v5034_v31, %v3392_v32  ;;  %v5640_v36 = vpop.f32.mrb[37].mxu0  ;;  %v3603_v32 = vadd.f32 %v5037_v30, %v7008_v22  ;;  %v5074_v30 = vld [vmem:[%s7223_s6 + $0x38] sm:$0xff] }
 0xe4f   : > { %5701 = vmatpush3.xpose.msk.msra.mxu1 %vm1518_vm6, %v3393_v34 }
 0xe50   : > { %5710 = vmatprep.subr.mxu1 %v6105_v39 }
 0xe52   : > { %5703 = vmatmul.mubr.msk.f32.vlgmr.msra.gmra.mrb[42].mxu1 %vm1518_vm6, %v3113_v37 }
 0xe53   : > { %5712 = vmatprep.mubr.msk.f32.mxu1 %vm6106_vm1, %v6105_v39 }
 0xe54   : > { %v3532_v40 = vpop.f32.mrb[38].mxu0 }
 0xe55   : > { %v3533_v43 = vadd.f32 %v5036_v38, %v3532_v40  ;;  %v5662_v45 = vpop.f32.mrb[39].mxu0  ;;  %v5038_v38 = vld [vmem:[%s7221_s4 + $0x17] ss:$0 sm:$0xff] }
 0xe57   : > { %5711 = vmatpush3.msra.mxu1 %v3533_v43 }
 0xe58   : > { %5720 = vmatprep.subr.mxu1 %v6105_v39 }
 0xe5c   : > { %v7036_v46 = vpop.f32.mrb[40].mxu0 }
 0xe5d   : > { %v5684_v47 = vpop.f32.mrb[41].mxu0  ;;  %v3673_v45 = vadd.f32 %v5038_v38, %v7036_v46  ;;  %v5064_v46 = vld [vmem:[%s7222_s5 + $0x28] sm:$0xff] }
 0xefd   : > { %v3748_v48 = vpop.f32.mrb[38].mxu1 }
 0xefe   : > { %v3980_v49 = vsel %vm519_vm7, %v3748_v48, -1e+30  ;;  %v5689_v50 = vpop.f32.mrb[39].mxu1 }
 0xeff   : > { %v3984_v27 = vsel %vm1518_vm6, %v3980_v49, -inf  ;;  %v5065_v50 = vld [vmem:[%s7222_s5 + $0x30] sm:$0xff] }
 0xf00   : > { %3985 = vmax.xlane.f32.xlu0 %v3984_v27 }
 0xf0a   : > { %v3900_v52 = vpop.f32.mrb[42].mxu0 }
 0xf0b   : > { %v3982_v53 = vsel %vm519_vm7, %v3900_v52, -1e+30  ;;  %v5699_v54 = vpop.f32.mrb[43].mxu0 }
 0xf0c   : > { %v3990_v57 = vsel %vm1518_vm6, %v3982_v53, -inf }
 0xf0d   : > { %3991 = vmax.xlane.f32.xlu0 %v3990_v57  ;;  %v5066_v57 = vld [vmem:[%s7222_s5 + $0x38] sm:$0xff] }
 0xf1d   : > { %v3824_v44 = vpop.f32.mrb[40].mxu1 }
 0xf1e   : > { %v3981_v59 = vsel %vm519_vm7, %v3824_v44, -1e+30  ;;  %v5694_v63 = vpop.f32.mrb[41].mxu1 }
 0xf1f   : > { %v3987_v0 = vsel %vm1518_vm6, %v3981_v59, -inf }
 0xf20   : > { %3988 = vmax.xlane.f32.xlu1 %v3987_v0 }
 0xf25   : > { %v3976_v1 = vpop.f32.mrb[42].mxu1 }
 0xf26   : > { %v3983_v4 = vsel %vm519_vm7, %v3976_v1, -1e+30  ;;  %v5704_v6 = vpop.f32.mrb[43].mxu1 }
 0xf27   : > { %v3993_v51 = vsel %vm1518_vm6, %v3983_v4, -inf }
 0xf28   : > { %3994 = vmax.xlane.f32.xlu1 %v3993_v51 }
 0xf8d   : > { %v3986_v7 = vpop.xlane.xlu0 %3985 }
 0xf8e   : > { %v3996_v8 = vsub.f32 %v3980_v49, %v3986_v7  ;;  %v5063_v49 = vld [vmem:[%s7222_s5 + $0x20] sm:$0xff] }
 0xf90   : > { %v4000_v9 = vmul.f32 1.442695, %v3996_v8 }
 0xf92   : > { %6071 = vpow2.f32 %v4000_v9 }
 0xf9a   : > { %v3992_v10 = vpop.xlane.xlu0 %3991 }
 0xf9b   : > { %v3998_v11 = vsub.f32 %v3982_v53, %v3992_v10 }
 0xf9c   : > { %v6072_v5 = vpop.eup %6071 }
 0xf9d   : > { %v4004_v13 = vmul.f32 1.442695, %v3998_v11  ;;  %v4008_v14 = vsel %vm1518_vm6, %v6072_v5, 0.0 }
 0xf9e   : > { %4009 = vadd.xlane.f32.xlu0 %v4008_v14 }
 0xf9f   : > { %6073 = vpow2.f32 %v4004_v13 }
 0xfa9   : > { %v6074_v15 = vpop.eup %6073 }
 0xfaa   : > { %v4014_v41 = vsel %vm1518_vm6, %v6074_v15, 0.0 }
 0xfab   : > { %4015 = vadd.xlane.f32.xlu0 %v4014_v41 }
 0xfad   : > { %v3989_v16 = vpop.xlane.xlu1 %3988 }
 0xfae   : > { %v3997_v17 = vsub.f32 %v3981_v59, %v3989_v16 }
 0xfb0   : > { %v4002_v18 = vmul.f32 1.442695, %v3997_v17 }
 0xfb2   : > { %6075 = vpow2.f32 %v4002_v18 }
 0xfb5   : > { %v3995_v21 = vpop.xlane.xlu1 %3994 }
 0xfb6   : > { %v3999_v2 = vsub.f32 %v3983_v4, %v3995_v21 }
 0xfb8   : > { %v4006_v23 = vmul.f32 1.442695, %v3999_v2 }
 0xfba   : > { %6077 = vpow2.f32 %v4006_v23 }
 0xfbc   : > { %v6076_v58 = vpop.eup %6075 }
 0xfbd   : > { %v4011_v24 = vsel %vm1518_vm6, %v6076_v58, 0.0 }
 0xfbe   : > { %4012 = vadd.xlane.f32.xlu1 %v4011_v24 }
 0xfc4   : > { %v6078_v25 = vpop.eup %6077 }
 0xfc5   : > { %v4017_v26 = vsel %vm1518_vm6, %v6078_v25, 0.0 }
 0xfc6   : > { %4018 = vadd.xlane.f32.xlu1 %v4017_v26 }
0x102b   : > { %v4010_v29 = vpop.xlane.xlu0 %4009 }
0x102c   : > { %6079 = vrcp.f32 %v4010_v29  ;;  %v5073_v29 = vld [vmem:[%s7223_s6 + $0x30] sm:$0xff] }
0x1036   : > { %v6080_v61 = vpop.eup %6079 }
0x1037   : > { %v4024_v31 = vmul.f32 %v6080_v61, %v6072_v5  ;;  %v6005_v61 = vpack.c.bf16 %v5074_v30, %v5073_v29 }
0x1038   : > { %v4016_v33 = vpop.xlane.xlu0 %4015 }
0x1039   : > { %6081 = vrcp.f32 %v4016_v33  ;;  %5708 = vmatmul.mubr.msk.f32.vlgmr.msra.gmra.mrb[44].mxu0 %vm1518_vm6, %v4024_v31 }
0x103a   : > { %5716 = vmatpush3.msra.mxu0 %v3603_v32  ;;  %5717 = vmatprep.mubr.msk.f32.mxu0 %vm6106_vm1, %v6105_v39 }
0x103b   : > { %5725 = vmatprep.subr.mxu0 %v6105_v39 }
0x1043   : > { %v6082_v34 = vpop.eup %6081 }
0x1044   : > { %v4026_v36 = vmul.f32 %v6082_v34, %v6074_v15  ;;  %v4646_v34 = vrot.slane %v6649_v56, %v540_v28  ;;  %v5079_v28 = vld [vmem:[%s7224_s7 + $0x90] sm:$0xff] }
0x1046   : > { %5718 = vmatmul.mubr.msk.f32.vlgmr.msra.gmra.mrb[46].mxu0 %vm1518_vm6, %v4026_v36 }
0x1047   : > { %5727 = vmatprep.mubr.msk.f32.mxu0 %vm6106_vm1, %v6105_v39  ;;  %5726 = vmatpush3.msra.mxu0 %v5063_v49  ;;  %v5082_v49 = vld [vmem:[%s7224_s7 + $0xa8] sm:$0xff] }
0x1048   : > { %5735 = vmatprep.subr.mxu0 %v6105_v39 }
0x104b   : > { %v4013_v37 = vpop.xlane.xlu1 %4012 }
0x104c   : > { %6083 = vrcp.f32 %v4013_v37 }
0x1053   : > { %v4019_v22 = vpop.xlane.xlu1 %4018 }
0x1054   : > { %6085 = vrcp.f32 %v4019_v22  ;;  %v4651_v22 = vrot.slane %v6649_v56, %v2487_v19 }
0x1056   : > { %v6084_v40 = vpop.eup %6083 }
0x1057   : > { %v4025_v43 = vmul.f32 %v6084_v40, %v6076_v58 }
0x1059   : > { %5713 = vmatmul.mubr.msk.f32.vlgmr.msra.gmra.mrb[44].mxu1 %vm1518_vm6, %v4025_v43  ;;  %v5077_v43 = vld [vmem:[%s7224_s7 + $0x80] sm:$0xff] }
0x105a   : > { %5721 = vmatpush3.msra.mxu1 %v3673_v45  ;;  %5722 = vmatprep.mubr.msk.f32.mxu1 %vm6106_vm1, %v6105_v39  ;;  %v5078_v45 = vld [vmem:[%s7224_s7 + $0x88] sm:$0xff] }
0x105b   : > { %5730 = vmatprep.subr.mxu1 %v6105_v39 }
0x105e   : > { %v6086_v47 = vpop.eup %6085 }
0x105f   : > { %v4027_v48 = vmul.f32 %v6086_v47, %v6078_v25  ;;  %v6008_v47 = vpack.c.bf16 %v5078_v45, %v5077_v43 }
0x1061   : > { %5723 = vmatmul.mubr.msk.f32.vlgmr.msra.gmra.mrb[46].mxu1 %vm1518_vm6, %v4027_v48  ;;  %v5081_v48 = vld [vmem:[%s7224_s7 + $0xa0] sm:$0xff] }
0x1062   : > { %5732 = vmatprep.mubr.msk.f32.mxu1 %vm6106_vm1, %v6105_v39  ;;  %5731 = vmatpush3.msra.mxu1 %v5064_v46  ;;  %v6014_v46 = vpack.c.bf16 %v5082_v49, %v5081_v48 }
0x1063   : > { %5740 = vmatprep.subr.mxu1 %v6105_v39 }
0x110c   : > { %v4097_v27 = vpop.f32.mrb[44].mxu0 }
0x110d   : > { %v5709_v52 = vpop.f32.mrb[45].mxu0  ;;  %5728 = vmatmul.mubr.msk.f32.vlgmr.msra.gmra.mrb[48].mxu0 %vm1518_vm6, %v4097_v27  ;;  %v5084_v27 = vld [vmem:[%s7224_s7 + $0xb8] sm:$0xff] }
0x110e   : > { %5736 = vmatpush3.msra.mxu0 %v5065_v50  ;;  %5737 = vmatprep.mubr.msk.f32.mxu0 %vm6106_vm1, %v6105_v39  ;;  %v5083_v50 = vld [vmem:[%s7224_s7 + $0xb0] sm:$0xff] }
0x110f   : > { %6001 = vmatprep.subr.bf16.mxu0 %v6104_v3  ;;  %v6017_v52 = vpack.c.bf16 %v5084_v27, %v5083_v50 }
0x1119   : > { %v4243_v53 = vpop.f32.mrb[46].mxu0 }
0x111a   : > { %v5719_v54 = vpop.f32.mrb[47].mxu0  ;;  %5738 = vmatmul.mubr.msk.f32.vlgmr.msra.gmra.mrb[50].mxu0 %vm1518_vm6, %v4243_v53  ;;  %v5085_v53 = vld [vmem:[%s7224_s7 + $0xc0] sm:$0xff] }
0x111b   : > { %5753 = vmatprep.mubr.msk.f32.mxu0 %vm6106_vm1, %v6105_v39  ;;  %v5086_v54 = vld [vmem:[%s7224_s7 + $0xc8] sm:$0xff] }
0x112c   : > { %v4170_v44 = vpop.f32.mrb[44].mxu1 }
0x112d   : > { %v5714_v59 = vpop.f32.mrb[45].mxu1  ;;  %5733 = vmatmul.mubr.msk.f32.vlgmr.msra.gmra.mrb[48].mxu1 %vm1518_vm6, %v4170_v44  ;;  %v5087_v44 = vld [vmem:[%s7224_s7 + $0xd0] sm:$0xff] }
0x112e   : > { %5741 = vmatpush3.msra.mxu1 %v5066_v57  ;;  %5742 = vmatprep.mubr.msk.f32.mxu1 %vm6106_vm1, %v6105_v39  ;;  %v6020_v57 = vpack.c.bf16 %v5086_v54, %v5085_v53  ;;  %v5088_v59 = vld [vmem:[%s7224_s7 + $0xd8] sm:$0xff] }
0x112f   : > { %6007 = vmatprep.subr.bf16.mxu1 %v6104_v3 }
0x1134   : > { %v4316_v63 = vpop.f32.mrb[46].mxu1 }
0x1135   : > { %v5724_v0 = vpop.f32.mrb[47].mxu1  ;;  %5743 = vmatmul.mubr.msk.f32.vlgmr.msra.gmra.mrb[50].mxu1 %vm1518_vm6, %v4316_v63  ;;  %v6023_v63 = vpack.c.bf16 %v5088_v59, %v5087_v44 }
0x1136   : > { %5788 = vmatprep.mubr.msk.f32.mxu1 %vm6106_vm1, %v6105_v39  ;;  %v4628_v39 = vrot.slane %v6649_v56, %v2492_v20  ;;  %v5071_v20 = vld [vmem:[%s7223_s6 + $0x20] sm:$0xff]  ;;  %6009 = vmatpush3.bf16.msra.mxu1 %v6008_v47  ;;  %v5080_v56 = vld [vmem:[%s7224_s7 + $0x98] sm:$0xff] }
0x1137   : > { %6010 = vmatprep.subr.bf16.mxu1 %v6104_v3  ;;  %v6011_v19 = vpack.c.bf16 %v5080_v56, %v5079_v28  ;;  %v5089_v0 = vld [vmem:[%s7224_s7 + $0xe0] sm:$0xff] }
0x113a   : > { %6012 = vmatpush3.bf16.msra.mxu1 %v6011_v19 }
0x113b   : > { %6013 = vmatprep.subr.bf16.mxu1 %v6104_v3 }
0x113e   : > { %6015 = vmatpush3.bf16.msra.mxu1 %v6014_v46 }
0x113f   : > { %6016 = vmatprep.subr.bf16.mxu1 %v6104_v3 }
0x1142   : > { %6018 = vmatpush3.bf16.msra.mxu1 %v6017_v52 }
0x1143   : > { %6019 = vmatprep.subr.bf16.mxu1 %v6104_v3 }
0x1146   : > { %6021 = vmatpush3.bf16.msra.mxu1 %v6020_v57 }
0x1147   : > { %6022 = vmatprep.subr.bf16.mxu1 %v6104_v3 }
0x114a   : > { %6024 = vmatpush3.bf16.msra.mxu1 %v6023_v63 }
0x114b   : > { %6025 = vmatprep.subr.bf16.mxu1 %v6104_v3 }
0x11e0   : > { %v4394_v1 = vpop.f32.mrb[48].mxu0 }
0x11e1   : > { %v5729_v4 = vpop.f32.mrb[49].mxu0  ;;  %v4617_v8 = vsel %vm494_vm5, %v4394_v1, 0.0  ;;  %v5090_v1 = vld [vmem:[%s7224_s7 + $0xe8] sm:$0xff] }
0x11e2   : > { %v6026_v4 = vpack.c.bf16 %v5090_v1, %v5089_v0 }
0x11e4   : > { %6027 = vmatpush3.bf16.msra.mxu1 %v6026_v4 }
0x11e5   : > { %6028 = vmatprep.subr.bf16.mxu1 %v6104_v3 }
0x11ed   : > { %v4540_v6 = vpop.f32.mrb[50].mxu0 }
0x11ee   : > { %v5739_v51 = vpop.f32.mrb[51].mxu0  ;;  %v4620_v5 = vsel %vm494_vm5, %v4540_v6, 0.0  ;;  %v5091_v6 = vld [vmem:[%s7224_s7 + $0xf0] sm:$0xff] }
0x11ef   : > { %v5092_v51 = vld [vmem:[%s7224_s7 + $0xf8] sm:$0xff] }
0x1200   : > { %v4467_v7 = vpop.f32.mrb[48].mxu1 }
0x1201   : > { %v4618_v9 = vsel %vm494_vm5, %v4467_v7, 0.0  ;;  %v5734_v10 = vpop.f32.mrb[49].mxu1  ;;  %v6029_v7 = vpack.c.bf16 %v5092_v51, %v5091_v6 }
0x1202   : > { %v4619_v11 = vadd.f32 %v4618_v9, %v4617_v8  ;;  %v307_v8 = vld [vmem:[%s7219_s2 + $0x18] sm:$0xff] }
0x1203   : > { %6030 = vmatpush3.bf16.msra.mxu1 %v6029_v7  ;;  %v4661_v9 = vrot.slane %v307_v8, %v6282_v62 }
0x1204   : > { %v4621_v13 = vadd.f32 %v4620_v5, %v4619_v11 }
0x1208   : > { %v4613_v14 = vpop.f32.mrb[50].mxu1 }
0x1209   : > { %v4622_v15 = vsel %vm494_vm5, %v4613_v14, 0.0  ;;  %v5744_v41 = vpop.f32.mrb[51].mxu1 }
0x120a   : > { %v4623_v16 = vadd.f32 %v4622_v15, %v4621_v13 }
0x120c   : > { %v4624_v17 = vadd.f32 %v4623_v16, %v6751_v12  ;;  %v5072_v12 = vld [vmem:[%s7223_s6 + $0x28] sm:$0xff] }
0x120d   : > { %v6002_v26 = vpack.c.bf16 %v5072_v12, %v5071_v20 }
0x120e   : > { %v7112_v18 = vadd.f32 %v4628_v39, %v4624_v17  ;;  %v4834_v39 = vrot.slane %v307_v8, %v6274_v60  ;;  %v6095_v60 = vld [vmem:[%s7219_s2 + $0x8] sm:$0xff] }
0x120f   : > { %6003 = vmatpush3.bf16.msra.mxu0 %v6002_v26 }
0x1210   : > { %v4630_v21 = vsel %vm494_vm5, %v7112_v18, 0.0  ;;  %6004 = vmatprep.subr.bf16.mxu0 %v6104_v3 }
0x1211   : > { %4631 = vadd.xlane.f32.xlu0 %v4630_v21 }
0x1213   : > { %6006 = vmatpush3.bf16.msra.mxu0 %v6005_v61 }
0x129e   : > { %v4632_v2 = vpop.xlane.xlu0 %4631 }
0x129f   : > { %v4633_v23 = vmul.f32 0.03125, %v4632_v2 }
0x12a1   : > { %v4634_v58 = vsub.f32 %v7112_v18, %v4633_v23 }
0x12a3   : > { %v4635_v24 = vmul.f32 %v4634_v58, %v4634_v58 }
0x12a5   : > { %v4636_v25 = vsel %vm494_vm5, %v4635_v24, 0.0 }
0x12a6   : > { %4637 = vadd.xlane.f32.xlu1 %v4636_v25 }
0x1333   : > { %v4638_v31 = vpop.xlane.xlu1 %4637 }
0x1334   : > { %v4639_v32 = vmul.f32 0.03125, %v4638_v31  ;;  %v4857_v31 = vrot.slane %v6095_v60, %v2691_v35 }
0x1336   : > { %v4640_v33 = vadd.f32 1e-05, %v4639_v32 }
0x1338   : > { %6087 = vrsqrt.f32 %v4640_v33 }
0x1342   : > { %v6088_v36 = vpop.eup %6087 }
0x1343   : > { %v4642_v37 = vmul.f32 %v6088_v36, %v4634_v58 }
0x1345   : > { %v4647_v38 = vmul.f32 %v4646_v34, %v4642_v37 }
0x1347   : > { %v4652_v40 = vadd.f32 %v4651_v22, %v4647_v38 }
0x1349   : > { %5754 = vmatmul.mubr.msk.f32.vlgmr.msra.gmra.mrb[52].mxu0 %vm494_vm5, %v4652_v40 }
0x141c   : > { %v4731_v10 = vpop.f32.mrb[52].mxu0 }
0x141d   : > { %v4732_v11 = vadd.f32 %v4731_v10, %v4661_v9  ;;  %v5755_v5 = vpop.f32.mrb[53].mxu0 }
0x141f   : > { %v5076_v3 = vmul.f32 -1.702, %v4732_v11 }
0x1421   : > { %v4737_v13 = vmul.f32 1.442695, %v5076_v3 }
0x1423   : > { %6089 = vpow2.f32 %v4737_v13 }
0x142d   : > { %v6090_v14 = vpop.eup %6089 }
0x142e   : > { %v4739_v15 = vadd.f32 1.0, %v6090_v14 }
0x1430   : > { %6091 = vrcp.f32 %v4739_v15 }
0x143a   : > { %v6092_v41 = vpop.eup %6091 }
0x143b   : > { %v4742_v16 = vmul.f32 %v6092_v41, %v4732_v11 }
0x143d   : > { %5789 = vmatmul.mubr.f32.vlgmr.msra.gmra.mrb[52].mxu1 %v4742_v16 }
0x1510   : > { %v4826_v17 = vpop.f32.mrb[52].mxu1 }
0x1511   : > { %v4830_v21 = vadd.f32 %v4826_v17, %v7112_v18  ;;  %v5790_v2 = vpop.f32.mrb[53].mxu1  ;;  %v4852_v18 = vrot.slane %v6095_v60, %v2501_v55 }
0x1513   : > { %v4835_v23 = vadd.f32 %v4834_v39, %v4830_v21 }
0x1515   : > { %v4836_v62 = vsel %vm494_vm5, %v4835_v23, 0.0 }
0x1516   : > { %4837 = vadd.xlane.f32.xlu0 %v4836_v62 }
0x15a3   : > { %v4838_v58 = vpop.xlane.xlu0 %4837 }
0x15a4   : > { %v4839_v24 = vmul.f32 0.03125, %v4838_v58 }
0x15a6   : > { %v4840_v25 = vsub.f32 %v4835_v23, %v4839_v24 }
0x15a8   : > { %v4841_v20 = vmul.f32 %v4840_v25, %v4840_v25 }
0x15aa   : > { %v4842_v12 = vsel %vm494_vm5, %v4841_v20, 0.0 }
0x15ab   : > { %4843 = vadd.xlane.f32.xlu1 %v4842_v12 }
0x1638   : > { %v4844_v26 = vpop.xlane.xlu1 %4843 }
0x1639   : > { %v4845_v29 = vmul.f32 0.03125, %v4844_v26 }
0x163b   : > { %v4846_v30 = vadd.f32 1e-05, %v4845_v29 }
0x163d   : > { %6093 = vrsqrt.f32 %v4846_v30 }
0x1647   : > { %v6094_v61 = vpop.eup %6093 }
0x1648   : > { %v4848_v32 = vmul.f32 %v6094_v61, %v4840_v25 }
0x164a   : > { %v4853_v33 = vmul.f32 %v4852_v18, %v4848_v32 }
0x164c   : > { %v4858_v34 = vadd.f32 %v4857_v31, %v4853_v33 }
0x164e   : > { %4859 = vst.msk [vmem:[%s303_s29] sm:$0xff] %vm494_vm5, %v4858_v34 }
0x164f PF: > { %s18_s27 = sadd.s32 1, %s6102_s27  }
0x1650   : > { %p15_p4 = scmp.ge.s32.totalorder %s18_s27, 4  }
0x1652   :  { %17 = sbr.rel (!%p15_p4) target bundleno = 1 (0x1), region = 87 }

</bundles_post_ra>
